<compile_context>
chip_gen: v7x
topology: tpu7x:2x2x1
jax: 0.10.0
libtpu: 0.0.40
codegen_flags: <defaults>
</compile_context>

<pallas_src>
import functools

import jax
import jax.numpy as jnp
from jax.experimental import pallas as pl
from jax.experimental.pallas import tpu as pltpu

LEAKY_SLOPE = 0.2
BN_EPS = 1e-5
VMEM_LIMIT = 32 * 1024 * 1024


# ---------------------------------------------------------------------------
# Pallas kernel: one fused conv(4,2,1) grid step in transposed layout.
#   x_ref : (16*Ci, Mb)  bf16   im2col patches, Mb = Bt*OH*OW (lanes)
#   w_ref : (Co, 16*Ci)  bf16
#   b_ref : (Co, 1)      f32
# normalize=False -> out: (Co, Mb) bf16 = LeakyReLU(conv + bias)
# normalize=True  -> out: (Co, Mb) bf16 pre-activation, plus per-step f32
#                    channel sum / sum-of-squares partials (BN pass A).
# ---------------------------------------------------------------------------
def _conv_kernel(x_ref, w_ref, b_ref, *out_refs, normalize):
    y = jnp.dot(w_ref[...], x_ref[...], preferred_element_type=jnp.float32)
    y = y + b_ref[...]                                      # (Co, Mb) f32
    if normalize:
        y_ref, sum_ref, sq_ref = out_refs
        y_ref[...] = y.astype(y_ref.dtype)                  # lane-dense bf16 store
        sum_ref[0] = jnp.sum(y, axis=1, keepdims=True)      # f32 partials
        sq_ref[0] = jnp.sum(y * y, axis=1, keepdims=True)
    else:
        (o_ref,) = out_refs
        o_ref[...] = jnp.where(y > 0.0, y, LEAKY_SLOPE * y).astype(o_ref.dtype)


# ---------------------------------------------------------------------------
# Plain-JAX glue (tiny tensors; XLA fuses the affine/activation/pad/gather).
# ---------------------------------------------------------------------------
def _conv_patches_T(act_nchw, dtype):
    """NCHW -> transposed conv(4x4, s2, p1) patches of shape (16*Ci, B*OH*OW)."""
    B, Ci, H, W = act_nchw.shape
    OH, OW = H // 2, W // 2
    xp = jnp.pad(act_nchw, ((0, 0), (0, 0), (1, 1), (1, 1)))
    taps = [xp[:, :, kh:kh + 2 * OH - 1:2, kw:kw + 2 * OW - 1:2]
            for kh in range(4) for kw in range(4)]          # 16 x (B,Ci,OH,OW)
    pat = jnp.stack(taps, axis=0)                           # (16,B,Ci,OH,OW)
    pat = pat.transpose(0, 2, 1, 3, 4)                      # (16,Ci,B,OH,OW)
    return pat.reshape(16 * Ci, B * OH * OW).astype(dtype), OH, OW


def _prep_weight_T(w, dtype):
    """PyTorch (Co,Ci,4,4) -> (Co, 16*Ci); column order (kh, kw, ci)."""
    Co, Ci = w.shape[:2]
    return jnp.transpose(w, (0, 2, 3, 1)).reshape(Co, 16 * Ci).astype(dtype)


def _pick_bt(B, M0, target=1024):
    """Images per grid step: batch-block so each step stays lane-dense."""
    cands = [bt for bt in range(1, B + 1)
             if B % bt == 0 and (bt == B or (bt * M0) % 128 == 0)]
    within = [bt for bt in cands if bt * M0 <= max(target, M0)]
    return max(within) if within else min(cands)


def pallas_conv_block(act_nchw, p, *, normalize, mxu_dtype=jnp.bfloat16):
    """conv(4,2,1) [+ BatchNorm(batch stats)] + LeakyReLU; NCHW in / NCHW out."""
    B = act_nchw.shape[0]
    Co = p["w"].shape[0]
    patches, OH, OW = _conv_patches_T(act_nchw, mxu_dtype)  # (K, B*M0)
    K, M = patches.shape
    M0 = OH * OW
    Bt = _pick_bt(B, M0)
    nsteps = B // Bt
    Mb = Bt * M0

    w_t = _prep_weight_T(p["w"], mxu_dtype)                 # (Co, K)
    bias = p["b"].astype(jnp.float32).reshape(Co, 1)

    y_spec = pl.BlockSpec((Co, Mb), lambda i: (0, i))
    y_sd = jax.ShapeDtypeStruct((Co, M), mxu_dtype)
    if normalize:
        stat_spec = pl.BlockSpec((1, Co, 1), lambda i: (i, 0, 0))
        out_shape = (y_sd,
                     jax.ShapeDtypeStruct((nsteps, Co, 1), jnp.float32),
                     jax.ShapeDtypeStruct((nsteps, Co, 1), jnp.float32))
        out_specs = (y_spec, stat_spec, stat_spec)
    else:
        out_shape = y_sd
        out_specs = y_spec

    ib = jnp.dtype(mxu_dtype).itemsize
    cost = pl.CostEstimate(
        flops=2 * Co * K * M,
        transcendentals=0,
        bytes_accessed=(K * M + Co * K + Co * M) * ib + 2 * nsteps * Co * 4)

    res = pl.pallas_call(
        functools.partial(_conv_kernel, normalize=normalize),
        grid=(nsteps,),
        in_specs=[pl.BlockSpec((K, Mb), lambda i: (0, i)),
                  pl.BlockSpec((Co, K), lambda i: (0, 0)),
                  pl.BlockSpec((Co, 1), lambda i: (0, 0))],
        out_specs=out_specs,
        out_shape=out_shape,
        compiler_params=pltpu.CompilerParams(
            dimension_semantics=("parallel",), vmem_limit_bytes=VMEM_LIMIT),
        cost_estimate=cost,
    )(patches, w_t, bias)

    if normalize:
        y, psum, psq = res                                   # y: (Co, B*M0) bf16
        cnt = float(M)
        mean = jnp.sum(psum, axis=0) / cnt                   # (Co, 1) f32
        var = jnp.maximum(jnp.sum(psq, axis=0) / cnt - mean * mean, 0.0)
        scale = p["gamma"].reshape(Co, 1) * jax.lax.rsqrt(var + BN_EPS)
        shift = p["beta"].reshape(Co, 1) - mean * scale
        z = y.astype(jnp.float32) * scale + shift            # BN affine (pass B),
        out = jnp.where(z > 0.0, z, LEAKY_SLOPE * z)         # fused into consumer prep
    else:
        out = res
    return out.reshape(Co, B, OH, OW).transpose(1, 0, 2, 3)  # NCHW for next layer


def _final_conv_sigmoid(act_nchw, p):
    """conv(Ci->1, 4x4, stride 1, valid) + sigmoid. Lane-sparse: plain JAX."""
    y = jax.lax.conv_general_dilated(
        act_nchw.astype(jnp.float32), p["w"].astype(jnp.float32),
        window_strides=(1, 1), padding="VALID",
        dimension_numbers=("NCHW", "OIHW", "NCHW"),
        preferred_element_type=jnp.float32)
    return jax.nn.sigmoid(y + p["b"].reshape(1, -1, 1, 1))   # (B, 1, 1, 1)


def discriminator_forward(x_nchw, params, mxu_dtype=jnp.bfloat16):
    x = pallas_conv_block(x_nchw, params[0], normalize=False, mxu_dtype=mxu_dtype)
    x = pallas_conv_block(x, params[1], normalize=True, mxu_dtype=mxu_dtype)
    x = pallas_conv_block(x, params[2], normalize=True, mxu_dtype=mxu_dtype)
    x = pallas_conv_block(x, params[3], normalize=True, mxu_dtype=mxu_dtype)
    return _final_conv_sigmoid(x, params[4])


# ---------------------------------------------------------------------------
# Parameters (mirrors the PyTorch module's conv shapes).
# ---------------------------------------------------------------------------
def init_params(key, input_channels=3, base_channels=16):
    shapes = [
        (base_channels, input_channels, 4, 4),
        (base_channels * 2, base_channels, 4, 4),
        (base_channels * 4, base_channels * 2, 4, 4),
        (base_channels * 8, base_channels * 4, 4, 4),
        (1, base_channels * 8, 4, 4),
    ]
    params = []
    for s in shapes:
        key, kw_, kb_ = jax.random.split(key, 3)
        fan_in = s[1] * s[2] * s[3]
        w = jax.random.normal(kw_, s, jnp.float32) / jnp.sqrt(jnp.float32(fan_in))
        b = 0.01 * jax.random.normal(kb_, (s[0],), jnp.float32)
        params.append({
            "w": w, "b": b,
            "gamma": jnp.ones((s[0],), jnp.float32),
            "beta": jnp.zeros((s[0],), jnp.float32),
        })
    return params


# ---------------------------------------------------------------------------
# Pure-JAX references.  compute_dtype=bf16 mirrors the kernel's MXU rounding;
# compute_dtype=f32 is the PyTorch-equivalent (training-mode BN) path.
# ---------------------------------------------------------------------------
def ref_forward(x, params, compute_dtype=jnp.float32):
    def conv(x, p, stride, pad):
        y = jax.lax.conv_general_dilated(
            x.astype(compute_dtype), p["w"].astype(compute_dtype),
            (stride, stride), [(pad, pad), (pad, pad)],
            dimension_numbers=("NCHW", "OIHW", "NCHW"),
            preferred_element_type=jnp.float32)
        return y + p["b"].reshape(1, -1, 1, 1)

    def block(x, p, normalize):
        y = conv(x, p, 2, 1)
        if normalize:
            mean = jnp.mean(y, axis=(0, 2, 3))
            var = jnp.maximum(jnp.mean(y * y, axis=(0, 2, 3)) - mean * mean, 0.0)
            scale = p["gamma"] * jax.lax.rsqrt(var + BN_EPS)
            shift = p["beta"] - mean * scale
            y = y * scale.reshape(1, -1, 1, 1) + shift.reshape(1, -1, 1, 1)
        return jnp.where(y > 0, y, LEAKY_SLOPE * y)

    x = block(x, params[0], False)
    x = block(x, params[1], True)
    x = block(x, params[2], True)
    x = block(x, params[3], True)
    return jax.nn.sigmoid(conv(x, params[4], 1, 0))


# ---------------------------------------------------------------------------
if __name__ == "__main__":
    key = jax.random.PRNGKey(0)
    kx, kp = jax.random.split(key)

    # 64x64 is the smallest spatial size the module supports end to end
    # (64 -> 32 -> 16 -> 8 -> 4 -> 4x4 valid conv -> 1x1).
    x = jax.random.normal(kx, (2, 3, 64, 64), jnp.float32)
    params = init_params(kp)

    out = jax.block_until_ready(jax.jit(discriminator_forward)(x, params))
    assert out.shape == (2, 1, 1, 1), out.shape
    assert bool(jnp.all(jnp.isfinite(out))), "non-finite output"

    # Structural check vs a reference with matching bf16 MXU-operand rounding
    # (the kernel additionally stores BN pre-activations in bf16, hence the
    #  slightly looser tolerance than a bit-matched pipeline would allow).
    ref_bf16 = jax.block_until_ready(ref_forward(x, params, jnp.bfloat16))
    if not jnp.allclose(out, ref_bf16, rtol=3e-2, atol=3e-2):
        raise AssertionError(
            f"mismatch vs bf16 reference: {float(jnp.max(jnp.abs(out - ref_bf16)))}")

    # Loose semantic check vs the full-f32 (PyTorch-equivalent) reference.
    ref_f32 = jax.block_until_ready(ref_forward(x, params, jnp.float32))
    if not jnp.allclose(out, ref_f32, rtol=5e-2, atol=3e-2):
        raise AssertionError(
            f"mismatch vs f32 reference: {float(jnp.max(jnp.abs(out - ref_f32)))}")

    print("KERNEL_OK")
</pallas_src>

<mosaic_0001>
module attributes {stable_mosaic.version = 11 : i64} {
  func.func @_conv_kernel(%arg0: i32, %arg1: memref<48x1024xbf16, #tpu.memory_space<vmem>>, %arg2: memref<16x48xbf16, #tpu.memory_space<vmem>>, %arg3: memref<16x1xf32, #tpu.memory_space<vmem>>, %arg4: memref<16x1024xbf16, #tpu.memory_space<vmem>>) attributes {dimension_semantics = [#tpu.dimension_semantics<parallel>], iteration_bounds = array<i64: 2>, scalar_prefetch = 0 : i64, scratch_operands = 0 : i64, tpu.core_type = #tpu.core_type<tc>, window_params = [{transform_indices = @transform_0, window_bounds = array<i64: 48, 1024>}, {pipeline_mode = #tpu.pipeline_mode<synchronous>, transform_indices = @transform_1, window_bounds = array<i64: 16, 48>}, {pipeline_mode = #tpu.pipeline_mode<synchronous>, transform_indices = @transform_2, window_bounds = array<i64: 16, 1>}, {transform_indices = @transform_3, window_bounds = array<i64: 16, 1024>}]} {
    %c0 = arith.constant 0 : index
    %c0_0 = arith.constant 0 : index
    %0 = vector.load %arg2[%c0, %c0_0] : memref<16x48xbf16, #tpu.memory_space<vmem>>, vector<16x48xbf16>
    %c0_1 = arith.constant 0 : index
    %c0_2 = arith.constant 0 : index
    %1 = vector.load %arg1[%c0_1, %c0_2] : memref<48x1024xbf16, #tpu.memory_space<vmem>>, vector<48x1024xbf16>
    %cst = arith.constant dense<0.000000e+00> : vector<16x1024xf32>
    %2 = tpu.matmul %0, %1, %cst {dimension_numbers = #tpu.dot_dimension_numbers<[1], [0], [0], [1], [0, 0, 1, 1], [], []>} : vector<16x48xbf16>, vector<48x1024xbf16>, vector<16x1024xf32> -> vector<16x1024xf32>
    %c0_3 = arith.constant 0 : index
    %c0_4 = arith.constant 0 : index
    %3 = vector.load %arg3[%c0_3, %c0_4] : memref<16x1xf32, #tpu.memory_space<vmem>>, vector<16x1xf32>
    %4 = vector.broadcast %3 : vector<16x1xf32> to vector<16x1024xf32>
    %5 = arith.addf %2, %4 : vector<16x1024xf32>
    %cst_5 = arith.constant 0.000000e+00 : f32
    %6 = vector.broadcast %cst_5 : f32 to vector<16x1024xf32>
    %7 = arith.cmpf ogt, %5, %6 : vector<16x1024xf32>
    %cst_6 = arith.constant 2.000000e-01 : f32
    %8 = vector.broadcast %cst_6 : f32 to vector<16x1024xf32>
    %9 = arith.mulf %8, %5 : vector<16x1024xf32>
    %10 = arith.select %7, %5, %9 : vector<16x1024xi1>, vector<16x1024xf32>
    %11 = arith.truncf %10 : vector<16x1024xf32> to vector<16x1024xbf16>
    %c0_7 = arith.constant 0 : index
    %c0_8 = arith.constant 0 : index
    %12 = vector.load %arg4[%c0_7, %c0_8] : memref<16x1024xbf16, #tpu.memory_space<vmem>>, vector<16x1024xbf16>
    tpu.vector_store %arg4[%c0_7, %c0_8], %11 {strides = array<i32>} : memref<16x1024xbf16, #tpu.memory_space<vmem>>, vector<16x1024xbf16>,
    return
  }
  func.func @transform_0(%arg0: i32) -> (i32, i32) {
    %c0_i32 = arith.constant 0 : i32
    %c0_i32_0 = arith.constant 0 : i32
    return %c0_i32, %arg0 : i32, i32
  }
  func.func @transform_1(%arg0: i32) -> (i32, i32) {
    %c0_i32 = arith.constant 0 : i32
    %c0_i32_0 = arith.constant 0 : i32
    %c0_i32_1 = arith.constant 0 : i32
    return %c0_i32, %c0_i32_0 : i32, i32
  }
  func.func @transform_2(%arg0: i32) -> (i32, i32) {
    %c0_i32 = arith.constant 0 : i32
    %c0_i32_0 = arith.constant 0 : i32
    %c0_i32_1 = arith.constant 0 : i32
    return %c0_i32, %c0_i32_0 : i32, i32
  }
  func.func @transform_3(%arg0: i32) -> (i32, i32) {
    %c0_i32 = arith.constant 0 : i32
    %c0_i32_0 = arith.constant 0 : i32
    return %c0_i32, %arg0 : i32, i32
  }
}

module attributes {stable_mosaic.version = 11 : i64} {
  func.func @_conv_kernel(%arg0: i32, %arg1: memref<256x512xbf16, #tpu.memory_space<vmem>>, %arg2: memref<32x256xbf16, #tpu.memory_space<vmem>>, %arg3: memref<32x1xf32, #tpu.memory_space<vmem>>, %arg4: memref<32x512xbf16, #tpu.memory_space<vmem>>, %arg5: memref<1x32x1xf32, #tpu.memory_space<vmem>>, %arg6: memref<1x32x1xf32, #tpu.memory_space<vmem>>) attributes {dimension_semantics = [#tpu.dimension_semantics<parallel>], iteration_bounds = array<i64: 1>, scalar_prefetch = 0 : i64, scratch_operands = 0 : i64, tpu.core_type = #tpu.core_type<tc>, window_params = [{transform_indices = @transform_0, window_bounds = array<i64: 256, 512>}, {pipeline_mode = #tpu.pipeline_mode<synchronous>, transform_indices = @transform_1, window_bounds = array<i64: 32, 256>}, {pipeline_mode = #tpu.pipeline_mode<synchronous>, transform_indices = @transform_2, window_bounds = array<i64: 32, 1>}, {transform_indices = @transform_3, window_bounds = array<i64: 32, 512>}, {transform_indices = @transform_4, window_bounds = array<i64: 1, 32, 1>}, {transform_indices = @transform_5, window_bounds = array<i64: 1, 32, 1>}]} {
    %c0 = arith.constant 0 : index
    %c0_0 = arith.constant 0 : index
    %0 = vector.load %arg2[%c0, %c0_0] : memref<32x256xbf16, #tpu.memory_space<vmem>>, vector<32x256xbf16>
    %c0_1 = arith.constant 0 : index
    %c0_2 = arith.constant 0 : index
    %1 = vector.load %arg1[%c0_1, %c0_2] : memref<256x512xbf16, #tpu.memory_space<vmem>>, vector<256x512xbf16>
    %cst = arith.constant dense<0.000000e+00> : vector<32x512xf32>
    %2 = tpu.matmul %0, %1, %cst {dimension_numbers = #tpu.dot_dimension_numbers<[1], [0], [0], [1], [0, 0, 1, 1], [], []>} : vector<32x256xbf16>, vector<256x512xbf16>, vector<32x512xf32> -> vector<32x512xf32>
    %c0_3 = arith.constant 0 : index
    %c0_4 = arith.constant 0 : index
    %3 = vector.load %arg3[%c0_3, %c0_4] : memref<32x1xf32, #tpu.memory_space<vmem>>, vector<32x1xf32>
    %4 = vector.broadcast %3 : vector<32x1xf32> to vector<32x512xf32>
    %5 = arith.addf %2, %4 : vector<32x512xf32>
    %6 = arith.truncf %5 : vector<32x512xf32> to vector<32x512xbf16>
    %c0_5 = arith.constant 0 : index
    %c0_6 = arith.constant 0 : index
    %7 = vector.load %arg4[%c0_5, %c0_6] : memref<32x512xbf16, #tpu.memory_space<vmem>>, vector<32x512xbf16>
    tpu.vector_store %arg4[%c0_5, %c0_6], %6 {strides = array<i32>} : memref<32x512xbf16, #tpu.memory_space<vmem>>, vector<32x512xbf16>,
    %cst_7 = arith.constant dense<0.000000e+00> : vector<32xf32>
    %8 = vector.multi_reduction <add>, %5, %cst_7 [1] : vector<32x512xf32> to vector<32xf32>
    %9 = vector.shape_cast %8 : vector<32xf32> to vector<32x1xf32>
    %c0_8 = arith.constant 0 : index
    %c0_9 = arith.constant 0 : index
    %c0_10 = arith.constant 0 : index
    %10 = vector.load %arg5[%c0_8, %c0_9, %c0_10] : memref<1x32x1xf32, #tpu.memory_space<vmem>>, vector<1x32x1xf32>
    %11 = vector.shape_cast %10 : vector<1x32x1xf32> to vector<32x1xf32>
    %12 = vector.shape_cast %9 : vector<32x1xf32> to vector<1x32x1xf32>
    tpu.vector_store %arg5[%c0_8, %c0_9, %c0_10], %12 {strides = array<i32>} : memref<1x32x1xf32, #tpu.memory_space<vmem>>, vector<1x32x1xf32>,
    %13 = arith.mulf %5, %5 : vector<32x512xf32>
    %cst_11 = arith.constant dense<0.000000e+00> : vector<32xf32>
    %14 = vector.multi_reduction <add>, %13, %cst_11 [1] : vector<32x512xf32> to vector<32xf32>
    %15 = vector.shape_cast %14 : vector<32xf32> to vector<32x1xf32>
    %c0_12 = arith.constant 0 : index
    %c0_13 = arith.constant 0 : index
    %c0_14 = arith.constant 0 : index
    %16 = vector.load %arg6[%c0_12, %c0_13, %c0_14] : memref<1x32x1xf32, #tpu.memory_space<vmem>>, vector<1x32x1xf32>
    %17 = vector.shape_cast %16 : vector<1x32x1xf32> to vector<32x1xf32>
    %18 = vector.shape_cast %15 : vector<32x1xf32> to vector<1x32x1xf32>
    tpu.vector_store %arg6[%c0_12, %c0_13, %c0_14], %18 {strides = array<i32>} : memref<1x32x1xf32, #tpu.memory_space<vmem>>, vector<1x32x1xf32>,
    return
  }
  func.func @transform_0(%arg0: i32) -> (i32, i32) {
    %c0_i32 = arith.constant 0 : i32
    %c0_i32_0 = arith.constant 0 : i32
    return %c0_i32, %arg0 : i32, i32
  }
  func.func @transform_1(%arg0: i32) -> (i32, i32) {
    %c0_i32 = arith.constant 0 : i32
    %c0_i32_0 = arith.constant 0 : i32
    %c0_i32_1 = arith.constant 0 : i32
    return %c0_i32, %c0_i32_0 : i32, i32
  }
  func.func @transform_2(%arg0: i32) -> (i32, i32) {
    %c0_i32 = arith.constant 0 : i32
    %c0_i32_0 = arith.constant 0 : i32
    %c0_i32_1 = arith.constant 0 : i32
    return %c0_i32, %c0_i32_0 : i32, i32
  }
  func.func @transform_3(%arg0: i32) -> (i32, i32) {
    %c0_i32 = arith.constant 0 : i32
    %c0_i32_0 = arith.constant 0 : i32
    return %c0_i32, %arg0 : i32, i32
  }
  func.func @transform_4(%arg0: i32) -> (i32, i32, i32) {
    %c0_i32 = arith.constant 0 : i32
    %c0_i32_0 = arith.constant 0 : i32
    %c0_i32_1 = arith.constant 0 : i32
    return %arg0, %c0_i32, %c0_i32_0 : i32, i32, i32
  }
  func.func @transform_5(%arg0: i32) -> (i32, i32, i32) {
    %c0_i32 = arith.constant 0 : i32
    %c0_i32_0 = arith.constant 0 : i32
    %c0_i32_1 = arith.constant 0 : i32
    return %arg0, %c0_i32, %c0_i32_0 : i32, i32, i32
  }
}

module attributes {stable_mosaic.version = 11 : i64} {
  func.func @_conv_kernel(%arg0: i32, %arg1: memref<512x128xbf16, #tpu.memory_space<vmem>>, %arg2: memref<64x512xbf16, #tpu.memory_space<vmem>>, %arg3: memref<64x1xf32, #tpu.memory_space<vmem>>, %arg4: memref<64x128xbf16, #tpu.memory_space<vmem>>, %arg5: memref<1x64x1xf32, #tpu.memory_space<vmem>>, %arg6: memref<1x64x1xf32, #tpu.memory_space<vmem>>) attributes {dimension_semantics = [#tpu.dimension_semantics<parallel>], iteration_bounds = array<i64: 1>, scalar_prefetch = 0 : i64, scratch_operands = 0 : i64, tpu.core_type = #tpu.core_type<tc>, window_params = [{transform_indices = @transform_0, window_bounds = array<i64: 512, 128>}, {pipeline_mode = #tpu.pipeline_mode<synchronous>, transform_indices = @transform_1, window_bounds = array<i64: 64, 512>}, {pipeline_mode = #tpu.pipeline_mode<synchronous>, transform_indices = @transform_2, window_bounds = array<i64: 64, 1>}, {transform_indices = @transform_3, window_bounds = array<i64: 64, 128>}, {transform_indices = @transform_4, window_bounds = array<i64: 1, 64, 1>}, {transform_indices = @transform_5, window_bounds = array<i64: 1, 64, 1>}]} {
    %c0 = arith.constant 0 : index
    %c0_0 = arith.constant 0 : index
    %0 = vector.load %arg2[%c0, %c0_0] : memref<64x512xbf16, #tpu.memory_space<vmem>>, vector<64x512xbf16>
    %c0_1 = arith.constant 0 : index
    %c0_2 = arith.constant 0 : index
    %1 = vector.load %arg1[%c0_1, %c0_2] : memref<512x128xbf16, #tpu.memory_space<vmem>>, vector<512x128xbf16>
    %cst = arith.constant dense<0.000000e+00> : vector<64x128xf32>
    %2 = tpu.matmul %0, %1, %cst {dimension_numbers = #tpu.dot_dimension_numbers<[1], [0], [0], [1], [0, 0, 1, 1], [], []>} : vector<64x512xbf16>, vector<512x128xbf16>, vector<64x128xf32> -> vector<64x128xf32>
    %c0_3 = arith.constant 0 : index
    %c0_4 = arith.constant 0 : index
    %3 = vector.load %arg3[%c0_3, %c0_4] : memref<64x1xf32, #tpu.memory_space<vmem>>, vector<64x1xf32>
    %4 = vector.broadcast %3 : vector<64x1xf32> to vector<64x128xf32>
    %5 = arith.addf %2, %4 : vector<64x128xf32>
    %6 = arith.truncf %5 : vector<64x128xf32> to vector<64x128xbf16>
    %c0_5 = arith.constant 0 : index
    %c0_6 = arith.constant 0 : index
    %7 = vector.load %arg4[%c0_5, %c0_6] : memref<64x128xbf16, #tpu.memory_space<vmem>>, vector<64x128xbf16>
    tpu.vector_store %arg4[%c0_5, %c0_6], %6 {strides = array<i32>} : memref<64x128xbf16, #tpu.memory_space<vmem>>, vector<64x128xbf16>,
    %cst_7 = arith.constant dense<0.000000e+00> : vector<64xf32>
    %8 = vector.multi_reduction <add>, %5, %cst_7 [1] : vector<64x128xf32> to vector<64xf32>
    %9 = vector.shape_cast %8 : vector<64xf32> to vector<64x1xf32>
    %c0_8 = arith.constant 0 : index
    %c0_9 = arith.constant 0 : index
    %c0_10 = arith.constant 0 : index
    %10 = vector.load %arg5[%c0_8, %c0_9, %c0_10] : memref<1x64x1xf32, #tpu.memory_space<vmem>>, vector<1x64x1xf32>
    %11 = vector.shape_cast %10 : vector<1x64x1xf32> to vector<64x1xf32>
    %12 = vector.shape_cast %9 : vector<64x1xf32> to vector<1x64x1xf32>
    tpu.vector_store %arg5[%c0_8, %c0_9, %c0_10], %12 {strides = array<i32>} : memref<1x64x1xf32, #tpu.memory_space<vmem>>, vector<1x64x1xf32>,
    %13 = arith.mulf %5, %5 : vector<64x128xf32>
    %cst_11 = arith.constant dense<0.000000e+00> : vector<64xf32>
    %14 = vector.multi_reduction <add>, %13, %cst_11 [1] : vector<64x128xf32> to vector<64xf32>
    %15 = vector.shape_cast %14 : vector<64xf32> to vector<64x1xf32>
    %c0_12 = arith.constant 0 : index
    %c0_13 = arith.constant 0 : index
    %c0_14 = arith.constant 0 : index
    %16 = vector.load %arg6[%c0_12, %c0_13, %c0_14] : memref<1x64x1xf32, #tpu.memory_space<vmem>>, vector<1x64x1xf32>
    %17 = vector.shape_cast %16 : vector<1x64x1xf32> to vector<64x1xf32>
    %18 = vector.shape_cast %15 : vector<64x1xf32> to vector<1x64x1xf32>
    tpu.vector_store %arg6[%c0_12, %c0_13, %c0_14], %18 {strides = array<i32>} : memref<1x64x1xf32, #tpu.memory_space<vmem>>, vector<1x64x1xf32>,
    return
  }
  func.func @transform_0(%arg0: i32) -> (i32, i32) {
    %c0_i32 = arith.constant 0 : i32
    %c0_i32_0 = arith.constant 0 : i32
    return %c0_i32, %arg0 : i32, i32
  }
  func.func @transform_1(%arg0: i32) -> (i32, i32) {
    %c0_i32 = arith.constant 0 : i32
    %c0_i32_0 = arith.constant 0 : i32
    %c0_i32_1 = arith.constant 0 : i32
    return %c0_i32, %c0_i32_0 : i32, i32
  }
  func.func @transform_2(%arg0: i32) -> (i32, i32) {
    %c0_i32 = arith.constant 0 : i32
    %c0_i32_0 = arith.constant 0 : i32
    %c0_i32_1 = arith.constant 0 : i32
    return %c0_i32, %c0_i32_0 : i32, i32
  }
  func.func @transform_3(%arg0: i32) -> (i32, i32) {
    %c0_i32 = arith.constant 0 : i32
    %c0_i32_0 = arith.constant 0 : i32
    return %c0_i32, %arg0 : i32, i32
  }
  func.func @transform_4(%arg0: i32) -> (i32, i32, i32) {
    %c0_i32 = arith.constant 0 : i32
    %c0_i32_0 = arith.constant 0 : i32
    %c0_i32_1 = arith.constant 0 : i32
    return %arg0, %c0_i32, %c0_i32_0 : i32, i32, i32
  }
  func.func @transform_5(%arg0: i32) -> (i32, i32, i32) {
    %c0_i32 = arith.constant 0 : i32
    %c0_i32_0 = arith.constant 0 : i32
    %c0_i32_1 = arith.constant 0 : i32
    return %arg0, %c0_i32, %c0_i32_0 : i32, i32, i32
  }
}

module attributes {stable_mosaic.version = 11 : i64} {
  func.func @_conv_kernel(%arg0: i32, %arg1: memref<1024x32xbf16, #tpu.memory_space<vmem>>, %arg2: memref<128x1024xbf16, #tpu.memory_space<vmem>>, %arg3: memref<128x1xf32, #tpu.memory_space<vmem>>, %arg4: memref<128x32xbf16, #tpu.memory_space<vmem>>, %arg5: memref<1x128x1xf32, #tpu.memory_space<vmem>>, %arg6: memref<1x128x1xf32, #tpu.memory_space<vmem>>) attributes {dimension_semantics = [#tpu.dimension_semantics<parallel>], iteration_bounds = array<i64: 1>, scalar_prefetch = 0 : i64, scratch_operands = 0 : i64, tpu.core_type = #tpu.core_type<tc>, window_params = [{transform_indices = @transform_0, window_bounds = array<i64: 1024, 32>}, {pipeline_mode = #tpu.pipeline_mode<synchronous>, transform_indices = @transform_1, window_bounds = array<i64: 128, 1024>}, {pipeline_mode = #tpu.pipeline_mode<synchronous>, transform_indices = @transform_2, window_bounds = array<i64: 128, 1>}, {transform_indices = @transform_3, window_bounds = array<i64: 128, 32>}, {transform_indices = @transform_4, window_bounds = array<i64: 1, 128, 1>}, {transform_indices = @transform_5, window_bounds = array<i64: 1, 128, 1>}]} {
    %c0 = arith.constant 0 : index
    %c0_0 = arith.constant 0 : index
    %0 = vector.load %arg2[%c0, %c0_0] : memref<128x1024xbf16, #tpu.memory_space<vmem>>, vector<128x1024xbf16>
    %c0_1 = arith.constant 0 : index
    %c0_2 = arith.constant 0 : index
    %1 = vector.load %arg1[%c0_1, %c0_2] : memref<1024x32xbf16, #tpu.memory_space<vmem>>, vector<1024x32xbf16>
    %cst = arith.constant dense<0.000000e+00> : vector<128x32xf32>
    %2 = tpu.matmul %0, %1, %cst {dimension_numbers = #tpu.dot_dimension_numbers<[1], [0], [0], [1], [0, 0, 1, 1], [], []>} : vector<128x1024xbf16>, vector<1024x32xbf16>, vector<128x32xf32> -> vector<128x32xf32>
    %c0_3 = arith.constant 0 : index
    %c0_4 = arith.constant 0 : index
    %3 = vector.load %arg3[%c0_3, %c0_4] : memref<128x1xf32, #tpu.memory_space<vmem>>, vector<128x1xf32>
    %4 = vector.broadcast %3 : vector<128x1xf32> to vector<128x32xf32>
    %5 = arith.addf %2, %4 : vector<128x32xf32>
    %6 = arith.truncf %5 : vector<128x32xf32> to vector<128x32xbf16>
    %c0_5 = arith.constant 0 : index
    %c0_6 = arith.constant 0 : index
    %7 = vector.load %arg4[%c0_5, %c0_6] : memref<128x32xbf16, #tpu.memory_space<vmem>>, vector<128x32xbf16>
    tpu.vector_store %arg4[%c0_5, %c0_6], %6 {strides = array<i32>} : memref<128x32xbf16, #tpu.memory_space<vmem>>, vector<128x32xbf16>,
    %cst_7 = arith.constant dense<0.000000e+00> : vector<128xf32>
    %8 = vector.multi_reduction <add>, %5, %cst_7 [1] : vector<128x32xf32> to vector<128xf32>
    %9 = vector.shape_cast %8 : vector<128xf32> to vector<128x1xf32>
    %c0_8 = arith.constant 0 : index
    %c0_9 = arith.constant 0 : index
    %c0_10 = arith.constant 0 : index
    %10 = vector.load %arg5[%c0_8, %c0_9, %c0_10] : memref<1x128x1xf32, #tpu.memory_space<vmem>>, vector<1x128x1xf32>
    %11 = vector.shape_cast %10 : vector<1x128x1xf32> to vector<128x1xf32>
    %12 = vector.shape_cast %9 : vector<128x1xf32> to vector<1x128x1xf32>
    tpu.vector_store %arg5[%c0_8, %c0_9, %c0_10], %12 {strides = array<i32>} : memref<1x128x1xf32, #tpu.memory_space<vmem>>, vector<1x128x1xf32>,
    %13 = arith.mulf %5, %5 : vector<128x32xf32>
    %cst_11 = arith.constant dense<0.000000e+00> : vector<128xf32>
    %14 = vector.multi_reduction <add>, %13, %cst_11 [1] : vector<128x32xf32> to vector<128xf32>
    %15 = vector.shape_cast %14 : vector<128xf32> to vector<128x1xf32>
    %c0_12 = arith.constant 0 : index
    %c0_13 = arith.constant 0 : index
    %c0_14 = arith.constant 0 : index
    %16 = vector.load %arg6[%c0_12, %c0_13, %c0_14] : memref<1x128x1xf32, #tpu.memory_space<vmem>>, vector<1x128x1xf32>
    %17 = vector.shape_cast %16 : vector<1x128x1xf32> to vector<128x1xf32>
    %18 = vector.shape_cast %15 : vector<128x1xf32> to vector<1x128x1xf32>
    tpu.vector_store %arg6[%c0_12, %c0_13, %c0_14], %18 {strides = array<i32>} : memref<1x128x1xf32, #tpu.memory_space<vmem>>, vector<1x128x1xf32>,
    return
  }
  func.func @transform_0(%arg0: i32) -> (i32, i32) {
    %c0_i32 = arith.constant 0 : i32
    %c0_i32_0 = arith.constant 0 : i32
    return %c0_i32, %arg0 : i32, i32
  }
  func.func @transform_1(%arg0: i32) -> (i32, i32) {
    %c0_i32 = arith.constant 0 : i32
    %c0_i32_0 = arith.constant 0 : i32
    %c0_i32_1 = arith.constant 0 : i32
    return %c0_i32, %c0_i32_0 : i32, i32
  }
  func.func @transform_2(%arg0: i32) -> (i32, i32) {
    %c0_i32 = arith.constant 0 : i32
    %c0_i32_0 = arith.constant 0 : i32
    %c0_i32_1 = arith.constant 0 : i32
    return %c0_i32, %c0_i32_0 : i32, i32
  }
  func.func @transform_3(%arg0: i32) -> (i32, i32) {
    %c0_i32 = arith.constant 0 : i32
    %c0_i32_0 = arith.constant 0 : i32
    return %c0_i32, %arg0 : i32, i32
  }
  func.func @transform_4(%arg0: i32) -> (i32, i32, i32) {
    %c0_i32 = arith.constant 0 : i32
    %c0_i32_0 = arith.constant 0 : i32
    %c0_i32_1 = arith.constant 0 : i32
    return %arg0, %c0_i32, %c0_i32_0 : i32, i32, i32
  }
  func.func @transform_5(%arg0: i32) -> (i32, i32, i32) {
    %c0_i32 = arith.constant 0 : i32
    %c0_i32_0 = arith.constant 0 : i32
    %c0_i32_1 = arith.constant 0 : i32
    return %arg0, %c0_i32, %c0_i32_0 : i32, i32, i32
  }
}

</mosaic_0001>

<bundles_post_ra>
// kernel: discriminator_forward.4
= control target key start
LH: loop header
LB: loop body
LE: loop exit
PB: predicated region body
PF: predicated region fallthrough
CT: control target
= control target key end

     0   :  { %s908_s12 = smov 0   ;;  %s910_s13 = smov 0   ;;  %s1096_s0 = inlined_call_operand.vmem [shape: bf16[48,2048], index: 0, kind: input, shape index: {}]   ;;  %s1097_s1 = inlined_call_operand.vmem [shape: bf16[16,48], index: 1, kind: input, shape index: {}]   ;;  %s1098_s2 = inlined_call_operand.vmem [shape: f32[16,1], index: 2, kind: input, shape index: {}]   ;;  %s1099_s3 = inlined_call_operand.vmem [shape: bf16[16,2048], index: 3, kind: output, shape index: {}]  }
   0x1   :  { %s912_s14 = smov 0  }
   0x2 LB: > { %s774_s15 = sadd.s32 4294967295, %s885_s14   ;;  %s925_s16 = sadd.s32 1, %s885_s14   ;;  %s885_s14 = sphi %s912_s14, %s1103_s14   ;;  %s881_s13 = sphi %s910_s13, %s1102_s13   ;;  %s877_s12 = sphi %s908_s12, %s1101_s12  }
   0x3   : > { %s17_s17 = ssub.s32 %s885_s14, %s925_s16  ;;  %s20_s18 = sadd.s32 1, %s881_s13 }
   0x4   : > { %p18_p0 = scmp.eq.s32.totalorder %s17_s17, 0  ;;  %p27_p1 = scmp.ne.s32.totalorder %s881_s13, %s877_s12 }
   0x5   : > { %p28_p2 = scmp.eq.s32.totalorder %s885_s14, 0  ;;  %p99_p3 = scmp.eq.s32.totalorder %s774_s15, 1 }
   0x6   : > { %s936_s19 = scalar_select %p18_p0, %s881_s13, %s20_s18  }
   0x7   : > { %p29_p4 = por %p28_p2, %p27_p1  ;;  %p938_p5 = por %p99_p3, %p27_p1 }
   0x8   : > { %p777_p6 = scmp.ge.s32.totalorder %s885_s14, 2 }
   0xa   : > { %127 = sbr.rel (%p777_p6) target bundleno = 34 (0x22), region = 24 }
  0x11   : > { %130 = sbr.rel (!%p29_p4) target bundleno = 34 (0x22), region = 28  ;;  %s132_s21 = sand.u32 (%p29_p4), 1, %s881_s13  }
  0x12   : > { %s824_s22 = sshll.u32 (%p29_p4), %s885_s14, 5  ;;  %s834_s23 = smul.u32 (%p29_p4), 192, %s132_s21 }
  0x13   : > { %s948_s26 = scalar_lea.vmem (%p29_p4), %s1096_s0, %s824_s22 }
  0x14   : > { %v150_v0 = vld [vmem:[%s948_s26] sm:$0xff] (%p29_p4)  ;;  %v152_v1 = vld [vmem:[%s948_s26 + $0x8] sm:$0xff] (%p29_p4)  ;;  %v154_v2 = vld [vmem:[%s948_s26 + $0x10] sm:$0xff] (%p29_p4)  ;;  %s956_s27 = scalar_lea.vmem (%p29_p4), [#allocation2], %s834_s23 }
  0x15   : > { %v156_v3 = vld [vmem:[%s948_s26 + $0x18] sm:$0xff] (%p29_p4)  ;;  %v158_v4 = vld [vmem:[%s948_s26 + $0x40] sm:$0xff] (%p29_p4)  ;;  %v160_v5 = vld [vmem:[%s948_s26 + $0x48] sm:$0xff] (%p29_p4)  ;;  %151 = vst [vmem:[%s956_s27] sm:$0xff] (%p29_p4), %v150_v0 }
  0x16   : > { %153 = vst [vmem:[%s956_s27 + $0x8] sm:$0xff] (%p29_p4), %v152_v1  ;;  %155 = vst [vmem:[%s956_s27 + $0x10] sm:$0xff] (%p29_p4), %v154_v2  ;;  %v162_v6 = vld [vmem:[%s948_s26 + $0x50] sm:$0xff] (%p29_p4)  ;;  %v164_v7 = vld [vmem:[%s948_s26 + $0x58] sm:$0xff] (%p29_p4) }
  0x17   : > { %157 = vst [vmem:[%s956_s27 + $0x18] sm:$0xff] (%p29_p4), %v156_v3  ;;  %159 = vst [vmem:[%s956_s27 + $0x20] sm:$0xff] (%p29_p4), %v158_v4  ;;  %v166_v8 = vld [vmem:[%s948_s26 + $0x80] sm:$0xff] (%p29_p4)  ;;  %v168_v9 = vld [vmem:[%s948_s26 + $0x88] sm:$0xff] (%p29_p4) }
  0x18   : > { %161 = vst [vmem:[%s956_s27 + $0x28] sm:$0xff] %v160_v5  ;;  %163 = vst [vmem:[%s956_s27 + $0x30] sm:$0xff] %v162_v6  ;;  %v170_v10 = vld [vmem:[%s948_s26 + $0x90] sm:$0xff]  ;;  %v172_v11 = vld [vmem:[%s948_s26 + $0x98] sm:$0xff] }
  0x19   : > { %165 = vst [vmem:[%s956_s27 + $0x38] sm:$0xff] %v164_v7  ;;  %167 = vst [vmem:[%s956_s27 + $0x40] sm:$0xff] %v166_v8  ;;  %v174_v12 = vld [vmem:[%s948_s26 + $0xc0] sm:$0xff]  ;;  %v176_v13 = vld [vmem:[%s948_s26 + $0xc8] sm:$0xff] }
  0x1a   : > { %169 = vst [vmem:[%s956_s27 + $0x48] sm:$0xff] %v168_v9  ;;  %171 = vst [vmem:[%s956_s27 + $0x50] sm:$0xff] %v170_v10  ;;  %v178_v14 = vld [vmem:[%s948_s26 + $0xd0] sm:$0xff]  ;;  %v180_v15 = vld [vmem:[%s948_s26 + $0xd8] sm:$0xff] }
  0x1b   : > { %173 = vst [vmem:[%s956_s27 + $0x58] sm:$0xff] %v172_v11  ;;  %175 = vst [vmem:[%s956_s27 + $0x60] sm:$0xff] %v174_v12  ;;  %v182_v16 = vld [vmem:[%s948_s26 + $0x100] sm:$0xff]  ;;  %v184_v17 = vld [vmem:[%s948_s26 + $0x108] sm:$0xff] }
  0x1c   : > { %177 = vst [vmem:[%s956_s27 + $0x68] sm:$0xff] %v176_v13  ;;  %179 = vst [vmem:[%s956_s27 + $0x70] sm:$0xff] %v178_v14  ;;  %v186_v18 = vld [vmem:[%s948_s26 + $0x110] sm:$0xff]  ;;  %v188_v19 = vld [vmem:[%s948_s26 + $0x118] sm:$0xff] }
  0x1d   : > { %181 = vst [vmem:[%s956_s27 + $0x78] sm:$0xff] %v180_v15  ;;  %183 = vst [vmem:[%s956_s27 + $0x80] sm:$0xff] %v182_v16  ;;  %v190_v20 = vld [vmem:[%s948_s26 + $0x140] sm:$0xff]  ;;  %v192_v21 = vld [vmem:[%s948_s26 + $0x148] sm:$0xff] }
  0x1e   : > { %185 = vst [vmem:[%s956_s27 + $0x88] sm:$0xff] %v184_v17  ;;  %187 = vst [vmem:[%s956_s27 + $0x90] sm:$0xff] %v186_v18  ;;  %v194_v22 = vld [vmem:[%s948_s26 + $0x150] sm:$0xff]  ;;  %v196_v23 = vld [vmem:[%s948_s26 + $0x158] sm:$0xff] }
  0x1f   : > { %189 = vst [vmem:[%s956_s27 + $0x98] sm:$0xff] %v188_v19  ;;  %191 = vst [vmem:[%s956_s27 + $0xa0] sm:$0xff] %v190_v20 }
  0x20   : > { %193 = vst [vmem:[%s956_s27 + $0xa8] sm:$0xff] %v192_v21  ;;  %195 = vst [vmem:[%s956_s27 + $0xb0] sm:$0xff] %v194_v22 }
  0x21   : > { %197 = vst [vmem:[%s956_s27 + $0xb8] sm:$0xff] %v196_v23 }
  0x22 PF: > { %p780_p7 = scmp.ge.s32.totalorder %s885_s14, 1  ;;  %p202_p8 = scmp.lt.s32.totalorder %s885_s14, 3 }
  0x24   : > { %p203_p9 = pnand %p780_p7, %p202_p8 }
  0x25   : > { %s209_s28 = sand.u32 (!%p203_p9), 1, %s877_s12   ;;  %v887_v24 = vmov (!%p203_p9), 0   ;;  %v260_v25 = vld [vmem:[%s1098_s2] sm:$0xff] (!%p203_p9)  ;;  %v261_v26 = vld [vmem:[%s1098_s2 + $0x8] sm:$0xff] (!%p203_p9)  ;;  %vm397_vm0 = vcmask (!%p203_p9), 392192  }
  0x26   : > { %206 = sbr.rel (%p203_p9) target bundleno = 304 (0x130), region = 51  ;;  %433 = vmatprep.mubr.bf16.mxu0 (!%p203_p9), %v887_v24  ;;  %476 = vmatprep.mubr.bf16.mxu1 (!%p203_p9), %v887_v24  ;;  %v862_v59 = vld [vmem:[%s1097_s1] sm:$0xff] (!%p203_p9)   ;;  %s781_s10 = sshll.u32 (!%p203_p9), %s209_s28, 6 }
  0x27   : > { %s835_s29 = smul.u32 (!%p203_p9), 192, %s209_s28  ;;  %861 = vset.pattern.permute.xlu0 (!%p203_p9), %v887_v24  ;;  %s1057_s11 = scalar_lea.vmem (!%p203_p9), [#allocation3], %s781_s10 }
  0x28   : > { %264 = vperm.xlu0 (!%p203_p9), %861, %v260_v25  }
  0x29   : > { %s1014_s7 = scalar_lea.vmem (!%p203_p9), [#allocation2], %s835_s29 }
  0x2a   : > { %v236_v27 = vld [vmem:[%s1014_s7] sm:$0xff] (!%p203_p9)  ;;  %v237_v29 = vld [vmem:[%s1014_s7 + $0x8] sm:$0xff] (!%p203_p9)  ;;  %v238_v49 = vld [vmem:[%s1014_s7 + $0x10] sm:$0xff] (!%p203_p9) }
  0x2b   : > { %v240_v28 = vld [vmem:[%s1014_s7 + $0x20] sm:$0xff] (!%p203_p9)  ;;  %v241_v31 = vld [vmem:[%s1014_s7 + $0x28] sm:$0xff] (!%p203_p9)  ;;  %v242_v50 = vld [vmem:[%s1014_s7 + $0x30] sm:$0xff] (!%p203_p9) }
  0x2c   : > { %v784_v30 = vcombine.high (!%p203_p9), %v236_v27, %v240_v28  ;;  %v783_v32 = vcombine.low (!%p203_p9), %v236_v27, %v240_v28  ;;  %v244_v33 = vld [vmem:[%s1014_s7 + $0x40] sm:$0xff] (!%p203_p9)  ;;  %v786_v35 = vcombine.high (!%p203_p9), %v237_v29, %v241_v31  ;;  %v785_v36 = vcombine.low (!%p203_p9), %v237_v29, %v241_v31  ;;  %v245_v38 = vld [vmem:[%s1014_s7 + $0x48] sm:$0xff] (!%p203_p9)  ;;  %269 = vperm.xlu0 (!%p203_p9), %861, %v261_v26   ;;  %v239_v51 = vld [vmem:[%s1014_s7 + $0x18] sm:$0xff] (!%p203_p9) }
  0x2d   : > { %v248_v34 = vld [vmem:[%s1014_s7 + $0x60] sm:$0xff]  ;;  %v249_v39 = vld [vmem:[%s1014_s7 + $0x68] sm:$0xff]  ;;  %v243_v52 = vld [vmem:[%s1014_s7 + $0x38] sm:$0xff]  ;;  %v788_v55 = vcombine.high %v238_v49, %v242_v50  ;;  %v787_v62 = vcombine.low %v238_v49, %v242_v50  ;;  %s833_s12 = sshll.u32 (%p938_p5), %s774_s15, 5 }
  0x2e   : > { %v792_v37 = vcombine.high %v244_v33, %v248_v34  ;;  %v252_v40 = vld [vmem:[%s1014_s7 + $0x80] sm:$0xff]  ;;  %401 = vmatprep.subr.bf16.mxu0 %v784_v30  ;;  %v794_v41 = vcombine.high %v245_v38, %v249_v39  ;;  %v253_v43 = vld [vmem:[%s1014_s7 + $0x88] sm:$0xff]  ;;  %444 = vmatprep.subr.bf16.mxu1 %v786_v35  ;;  %v791_v45 = vcombine.low %v244_v33, %v248_v34  ;;  %v246_v57 = vld [vmem:[%s1014_s7 + $0x50] sm:$0xff]  ;;  %s686_s21 = scalar_lea.vmem (%p938_p5), %s1099_s3, %s833_s12 }
  0x2f   : > { %v256_v42 = vld [vmem:[%s1014_s7 + $0xa0] sm:$0xff]  ;;  %v257_v44 = vld [vmem:[%s1014_s7 + $0xa8] sm:$0xff]  ;;  %402 = vmatpush1.bf16.msra.mxu0 %v783_v32  ;;  %445 = vmatpush1.bf16.msra.mxu1 %v785_v36  ;;  %v793_v46 = vcombine.low %v245_v38, %v249_v39  ;;  %v790_v56 = vcombine.high %v239_v51, %v243_v52  ;;  %v250_v58 = vld [vmem:[%s1014_s7 + $0x70] sm:$0xff]  ;;  %v789_v63 = vcombine.low %v239_v51, %v243_v52 }
  0x30   : > { %403 = vmatprep.subr.bf16.mxu0 %v792_v37  ;;  %v800_v47 = vcombine.high %v252_v40, %v256_v42  ;;  %446 = vmatprep.subr.bf16.mxu1 %v794_v41  ;;  %v802_v48 = vcombine.high %v253_v43, %v257_v44  ;;  %v799_v53 = vcombine.low %v252_v40, %v256_v42  ;;  %v247_v60 = vld [vmem:[%s1014_s7 + $0x58] sm:$0xff]  ;;  %v254_v2 = vld [vmem:[%s1014_s7 + $0x90] sm:$0xff] }
  0x31   : > { %v801_v54 = vcombine.low %v253_v43, %v257_v44  ;;  %v251_v61 = vld [vmem:[%s1014_s7 + $0x78] sm:$0xff]  ;;  %v796_v0 = vcombine.high %v246_v57, %v250_v58  ;;  %v258_v3 = vld [vmem:[%s1014_s7 + $0xb0] sm:$0xff]  ;;  %v795_v6 = vcombine.low %v246_v57, %v250_v58 }
  0x32   : > { %v798_v1 = vcombine.high %v247_v60, %v251_v61  ;;  %v255_v4 = vld [vmem:[%s1014_s7 + $0x98] sm:$0xff]  ;;  %v797_v7 = vcombine.low %v247_v60, %v251_v61  ;;  %v804_v8 = vcombine.high %v254_v2, %v258_v3  ;;  %v803_v10 = vcombine.low %v254_v2, %v258_v3 }
  0x33   : > { %404 = vmatpush1.bf16.msra.mxu0 %v791_v45  ;;  %447 = vmatpush1.bf16.msra.mxu1 %v793_v46  ;;  %v259_v5 = vld [vmem:[%s1014_s7 + $0xb8] sm:$0xff] }
  0x34   : > { %405 = vmatprep.subr.bf16.mxu0 %v800_v47  ;;  %448 = vmatprep.subr.bf16.mxu1 %v802_v48  ;;  %v806_v9 = vcombine.high %v255_v4, %v259_v5  ;;  %v805_v11 = vcombine.low %v255_v4, %v259_v5 }
  0x37   : > { %406 = vmatpush1.bf16.msra.mxu0 %v799_v53  ;;  %449 = vmatpush1.bf16.msra.mxu1 %v801_v54 }
  0x38   : > { %487 = vmatprep.subr.bf16.mxu0 %v788_v55  ;;  %530 = vmatprep.subr.bf16.mxu1 %v790_v56 }
  0x3a   : > { %807 = vmatmul.mubr.msk.bf16.vlgmr.msra.gmra.mrb[0].mxu0 %vm397_vm0, %v862_v59  ;;  %808 = vmatmul.mubr.msk.bf16.vlgmr.msra.gmra.mrb[0].mxu1 %vm397_vm0, %v862_v59 }
  0x3b   : > { %488 = vmatpush1.bf16.msra.mxu0 %v787_v62  ;;  %531 = vmatpush1.bf16.msra.mxu1 %v789_v63 }
  0x3c   : > { %489 = vmatprep.subr.bf16.mxu0 %v796_v0  ;;  %532 = vmatprep.subr.bf16.mxu1 %v798_v1 }
  0x3d   : > { %519 = vmatprep.mubr.bf16.mxu0 %v887_v24  ;;  %562 = vmatprep.mubr.bf16.mxu1 %v887_v24 }
  0x3f   : > { %490 = vmatpush1.bf16.msra.mxu0 %v795_v6  ;;  %533 = vmatpush1.bf16.msra.mxu1 %v797_v7 }
  0x40   : > { %491 = vmatprep.subr.bf16.mxu0 %v804_v8  ;;  %534 = vmatprep.subr.bf16.mxu1 %v806_v9 }
  0x43   : > { %492 = vmatpush1.bf16.msra.mxu0 %v803_v10  ;;  %535 = vmatpush1.bf16.msra.mxu1 %v805_v11 }
  0x46   : > { %809 = vmatmul.mubr.msk.bf16.vlgmr.msra.gmra.mrb[4].mxu0 %vm397_vm0, %v862_v59  ;;  %810 = vmatmul.mubr.msk.bf16.vlgmr.msra.gmra.mrb[4].mxu1 %vm397_vm0, %v862_v59 }
  0xa7   : > { %v265_v12 = vpop.permute.xlu0 %264 }
  0xab   : > { %v1049_v14 = vpop.permute.xlu0 %269 }
 0x10d   : > { %v435_v13 = vpop.f32.mrb[0].mxu0  ;;  %v478_v16 = vpop.f32.mrb[0].mxu1 }
 0x10e   : > { %v436_v15 = vadd.f32 %v435_v13, %v265_v12  ;;  %v437_v17 = vpop.f32.mrb[1].mxu0  ;;  %v479_v18 = vadd.f32 %v478_v16, %v265_v12  ;;  %v480_v20 = vpop.f32.mrb[1].mxu1 }
 0x10f   : > { %v438_v19 = vadd.f32 %v437_v17, %v265_v12  ;;  %v439_v21 = vpop.f32.mrb[2].mxu0  ;;  %v481_v23 = vadd.f32 %v480_v20, %v265_v12  ;;  %v482_v25 = vpop.f32.mrb[2].mxu1 }
 0x110   : > { %vm573_vm1 = vcmp.gt.f32.partialorder %v436_v15, 0.0  ;;  %v589_v22 = vmul.f32 0.2, %v436_v15  ;;  %v440_v24 = vadd.f32 %v439_v21, %v1049_v14  ;;  %v441_v26 = vpop.f32.mrb[3].mxu0  ;;  %vm575_vm2 = vcmp.gt.f32.partialorder %v479_v18, 0.0  ;;  %v484_v31 = vpop.f32.mrb[3].mxu1 }
 0x111   : > { %v591_v27 = vmul.f32 0.2, %v479_v18  ;;  %vm574_vm3 = vcmp.gt.f32.partialorder %v438_v19, 0.0  ;;  %v590_v28 = vmul.f32 0.2, %v438_v19  ;;  %vm576_vm4 = vcmp.gt.f32.partialorder %v481_v23, 0.0 }
 0x112   : > { %v605_v29 = vsel %vm573_vm1, %v436_v15, %v589_v22  ;;  %v592_v30 = vmul.f32 0.2, %v481_v23  ;;  %vm581_vm5 = vcmp.gt.f32.partialorder %v440_v24, 0.0  ;;  %v597_v34 = vmul.f32 0.2, %v440_v24 }
 0x113   : > { %v607_v32 = vsel %vm575_vm2, %v479_v18, %v591_v27  ;;  %v606_v33 = vsel %vm574_vm3, %v438_v19, %v590_v28  ;;  %v483_v35 = vadd.f32 %v482_v25, %v1049_v14  ;;  %v442_v38 = vadd.f32 %v441_v26, %v1049_v14 }
 0x114   : > { %v825_v36 = vpack.c.bf16 %v606_v33, %v605_v29  ;;  %v608_v37 = vsel %vm576_vm4, %v481_v23, %v592_v30  ;;  %v485_v39 = vadd.f32 %v484_v31, %v1049_v14  ;;  %v613_v41 = vsel %vm581_vm5, %v440_v24, %v597_v34 }
 0x115   : > { %v826_v40 = vpack.c.bf16 %v608_v37, %v607_v32  ;;  %vm583_vm6 = vcmp.gt.f32.partialorder %v483_v35, 0.0  ;;  %v599_v42 = vmul.f32 0.2, %v483_v35  ;;  %vm582_vm7 = vcmp.gt.f32.partialorder %v442_v38, 0.0 }
 0x116   : > { %669 = vst [vmem:[%s1057_s11] sm:$0xff] %v825_v36  ;;  %v598_v43 = vmul.f32 0.2, %v442_v38  ;;  %vm584_vm8 = vcmp.gt.f32.partialorder %v485_v39, 0.0  ;;  %v600_v44 = vmul.f32 0.2, %v485_v39 }
 0x117   : > { %670 = vst [vmem:[%s1057_s11 + $0x8] sm:$0xff] %v826_v40  ;;  %v615_v45 = vsel %vm583_vm6, %v483_v35, %v599_v42 }
 0x118   : > { %v614_v46 = vsel %vm582_vm7, %v442_v38, %v598_v43  ;;  %v616_v47 = vsel %vm584_vm8, %v485_v39, %v600_v44 }
 0x119   : > { %v829_v48 = vpack.c.bf16 %v614_v46, %v613_v41  ;;  %v830_v49 = vpack.c.bf16 %v616_v47, %v615_v45  ;;  %v521_v50 = vpop.f32.mrb[4].mxu0  ;;  %v564_v52 = vpop.f32.mrb[4].mxu1 }
 0x11a   : > { %v522_v51 = vadd.f32 %v521_v50, %v265_v12  ;;  %v523_v53 = vpop.f32.mrb[5].mxu0  ;;  %v565_v54 = vadd.f32 %v564_v52, %v265_v12  ;;  %v566_v56 = vpop.f32.mrb[5].mxu1 }
 0x11b   : > { %673 = vst [vmem:[%s1057_s11 + $0x20] sm:$0xff] %v829_v48  ;;  %674 = vst [vmem:[%s1057_s11 + $0x28] sm:$0xff] %v830_v49  ;;  %v524_v55 = vadd.f32 %v523_v53, %v265_v12  ;;  %v525_v57 = vpop.f32.mrb[6].mxu0  ;;  %v567_v59 = vadd.f32 %v566_v56, %v265_v12  ;;  %v568_v61 = vpop.f32.mrb[6].mxu1 }
 0x11c   : > { %vm577_vm9 = vcmp.gt.f32.partialorder %v522_v51, 0.0  ;;  %v593_v58 = vmul.f32 0.2, %v522_v51  ;;  %v526_v60 = vadd.f32 %v525_v57, %v1049_v14  ;;  %v527_v62 = vpop.f32.mrb[7].mxu0  ;;  %vm579_vm10 = vcmp.gt.f32.partialorder %v565_v54, 0.0  ;;  %v570_v3 = vpop.f32.mrb[7].mxu1 }
 0x11d   : > { %v595_v63 = vmul.f32 0.2, %v565_v54  ;;  %vm578_vm11 = vcmp.gt.f32.partialorder %v524_v55, 0.0  ;;  %v594_v0 = vmul.f32 0.2, %v524_v55  ;;  %vm580_vm12 = vcmp.gt.f32.partialorder %v567_v59, 0.0 }
 0x11e   : > { %v609_v1 = vsel %vm577_vm9, %v522_v51, %v593_v58  ;;  %v596_v2 = vmul.f32 0.2, %v567_v59  ;;  %vm585_vm13 = vcmp.gt.f32.partialorder %v526_v60, 0.0  ;;  %v601_v6 = vmul.f32 0.2, %v526_v60  ;;  %v701_v23 = vld [vmem:[%s1057_s11 + $0x8] sm:$0xff] (%p938_p5) }
 0x11f   : > { %v611_v4 = vsel %vm579_vm10, %v565_v54, %v595_v63  ;;  %v610_v5 = vsel %vm578_vm11, %v524_v55, %v594_v0  ;;  %v569_v7 = vadd.f32 %v568_v61, %v1049_v14  ;;  %v528_v10 = vadd.f32 %v527_v62, %v1049_v14  ;;  %702 = vst [vmem:[%s686_s21 + $0x8] sm:$0xff] (%p938_p5), %v701_v23 }
 0x120   : > { %v827_v8 = vpack.c.bf16 %v610_v5, %v609_v1  ;;  %v612_v9 = vsel %vm580_vm12, %v567_v59, %v596_v2  ;;  %v571_v11 = vadd.f32 %v570_v3, %v1049_v14  ;;  %v617_v13 = vsel %vm585_vm13, %v526_v60, %v601_v6  ;;  %v699_v14 = vld [vmem:[%s1057_s11] sm:$0xff] (%p938_p5) }
 0x121   : > { %v828_v12 = vpack.c.bf16 %v612_v9, %v611_v4  ;;  %vm587_vm14 = vcmp.gt.f32.partialorder %v569_v7, 0.0  ;;  %v603_v15 = vmul.f32 0.2, %v569_v7  ;;  %vm586_vm15 = vcmp.gt.f32.partialorder %v528_v10, 0.0  ;;  %683 = sbr.rel (!%p938_p5) target bundleno = 304 (0x130), region = 59  ;;  %700 = vst [vmem:[%s686_s21] sm:$0xff] (%p938_p5), %v699_v14 }
 0x122   : > { %671 = vst [vmem:[%s1057_s11 + $0x10] sm:$0xff] %v827_v8  ;;  %v602_v16 = vmul.f32 0.2, %v528_v10  ;;  %vm588_vm0 = vcmp.gt.f32.partialorder %v571_v11, 0.0  ;;  %v604_v17 = vmul.f32 0.2, %v571_v11 }
 0x123   : > { %672 = vst [vmem:[%s1057_s11 + $0x18] sm:$0xff] %v828_v12  ;;  %v619_v18 = vsel %vm587_vm14, %v569_v7, %v603_v15  ;;  %v707_v26 = vld [vmem:[%s1057_s11 + $0x20] sm:$0xff] (%p938_p5)  ;;  %v709_v27 = vld [vmem:[%s1057_s11 + $0x28] sm:$0xff] (%p938_p5) }
 0x124   : > { %v618_v19 = vsel %vm586_vm15, %v528_v10, %v602_v16  ;;  %v620_v20 = vsel %vm588_vm0, %v571_v11, %v604_v17  ;;  %708 = vst [vmem:[%s686_s21 + $0x40] sm:$0xff] (%p938_p5), %v707_v26  ;;  %710 = vst [vmem:[%s686_s21 + $0x48] sm:$0xff] (%p938_p5), %v709_v27 }
 0x125   : > { %v831_v21 = vpack.c.bf16 %v618_v19, %v617_v13  ;;  %v832_v22 = vpack.c.bf16 %v620_v20, %v619_v18 }
 0x127   : > { %675 = vst [vmem:[%s1057_s11 + $0x30] sm:$0xff] %v831_v21  ;;  %676 = vst [vmem:[%s1057_s11 + $0x38] sm:$0xff] %v832_v22 }
 0x129   : > { %v703_v24 = vld [vmem:[%s1057_s11 + $0x10] sm:$0xff] }
 0x12a   : > { %v705_v25 = vld [vmem:[%s1057_s11 + $0x18] sm:$0xff]  ;;  %704 = vst [vmem:[%s686_s21 + $0x10] sm:$0xff] %v703_v24 }
 0x12b   : > { %706 = vst [vmem:[%s686_s21 + $0x18] sm:$0xff] %v705_v25 }
 0x12e   : > { %v711_v28 = vld [vmem:[%s1057_s11 + $0x30] sm:$0xff]  ;;  %v713_v29 = vld [vmem:[%s1057_s11 + $0x38] sm:$0xff] }
 0x12f   : > { %712 = vst [vmem:[%s686_s21 + $0x50] sm:$0xff] %v711_v28  ;;  %714 = vst [vmem:[%s686_s21 + $0x58] sm:$0xff] %v713_v29 }
 0x130 PF: > { %p10_p10 = scmp.ge.s32.totalorder %s925_s16, 4   ;;  %s1101_s12 = smov %s881_s13 }
 0x131   : > { %s1102_s13 = smov %s936_s19  ;;  %s1103_s14 = smov %s925_s16 }
 0x132   :  { %12 = sbr.rel (!%p10_p10) target bundleno = 2 (0x2), region = 113 }

// kernel: discriminator_forward.5
= control target key start
LH: loop header
LB: loop body
LE: loop exit
PB: predicated region body
PF: predicated region fallthrough
CT: control target
= control target key end

     0   :  { %v877_v1 = vmov 0   ;;  %vm631_vm0 = vcmask 7168   ;;  %s1180_s0 = inlined_call_operand.vmem [shape: bf16[256,512], index: 0, kind: input, shape index: {}]   ;;  %s1181_s1 = inlined_call_operand.vmem [shape: bf16[32,256], index: 1, kind: input, shape index: {}]   ;;  %s1182_s2 = inlined_call_operand.vmem [shape: f32[32,1], index: 2, kind: input, shape index: {}]   ;;  %s1183_s3 = inlined_call_operand.vmem [shape: bf16[32,512], index: 3, kind: output, shape index: {0}]   ;;  %s1184_s4 = inlined_call_operand.vmem [shape: f32[1,32,1], index: 4, kind: output, shape index: {1}]   ;;  %s1185_s5 = inlined_call_operand.vmem [shape: f32[1,32,1], index: 5, kind: output, shape index: {2}]  }
   0x1   :  { %v775_v0 = vld [vmem:[%s1180_s0 + $0x4] ss:$16 sps:$4 sm:$0xff]   ;;  %773 = vset.pattern.permute.xlu0 %v877_v1  ;;  %774 = vset.pattern.permute.xlu1 %v877_v1  ;;  %v777_v2 = vld [vmem:[%s1180_s0 + $0xc] ss:$16 sps:$4 sm:$0xff]   ;;  %v779_v3 = vld [vmem:[%s1180_s0] ss:$16 sps:$4 sm:$0xff]  }
   0x2   :  { %449 = vmatprep.subr.bf16.mxu0 %v775_v0  ;;  %v780_v4 = vld [vmem:[%s1180_s0 + $0x8] ss:$16 sps:$4 sm:$0xff]   ;;  %502 = vmatprep.subr.bf16.mxu1 %v777_v2  ;;  %v781_v5 = vld [vmem:[%s1180_s0 + $0x24] ss:$16 sps:$4 sm:$0xff]   ;;  %v783_v6 = vld [vmem:[%s1180_s0 + $0x2c] ss:$16 sps:$4 sm:$0xff]  }
   0x3   :  { %450 = vmatpush1.bf16.msra.mxu0 %v779_v3  ;;  %503 = vmatpush1.bf16.msra.mxu1 %v780_v4  ;;  %v785_v7 = vld [vmem:[%s1180_s0 + $0x20] ss:$16 sps:$4 sm:$0xff]   ;;  %v786_v8 = vld [vmem:[%s1180_s0 + $0x28] ss:$16 sps:$4 sm:$0xff]   ;;  %v787_v9 = vld [vmem:[%s1180_s0 + $0x44] ss:$16 sps:$4 sm:$0xff]  }
   0x4   :  { %451 = vmatprep.subr.bf16.mxu0 %v781_v5  ;;  %504 = vmatprep.subr.bf16.mxu1 %v783_v6  ;;  %v789_v10 = vld [vmem:[%s1180_s0 + $0x4c] ss:$16 sps:$4 sm:$0xff]   ;;  %v791_v11 = vld [vmem:[%s1180_s0 + $0x40] ss:$16 sps:$4 sm:$0xff]   ;;  %v792_v12 = vld [vmem:[%s1180_s0 + $0x48] ss:$16 sps:$4 sm:$0xff]  }
   0x5   :  { %v793_v13 = vld [vmem:[%s1180_s0 + $0x64] ss:$16 sps:$4 sm:$0xff]   ;;  %v795_v14 = vld [vmem:[%s1180_s0 + $0x6c] ss:$16 sps:$4 sm:$0xff]   ;;  %v797_v15 = vld [vmem:[%s1180_s0 + $0x60] ss:$16 sps:$4 sm:$0xff]  }
   0x6   :  { %v798_v16 = vld [vmem:[%s1180_s0 + $0x68] ss:$16 sps:$4 sm:$0xff]   ;;  %v799_v17 = vld [vmem:[%s1180_s0 + $0x84] ss:$16 sps:$4 sm:$0xff]   ;;  %v801_v18 = vld [vmem:[%s1180_s0 + $0x8c] ss:$16 sps:$4 sm:$0xff]  }
   0x7   :  { %452 = vmatpush1.bf16.msra.mxu0 %v785_v7  ;;  %505 = vmatpush1.bf16.msra.mxu1 %v786_v8  ;;  %v803_v19 = vld [vmem:[%s1180_s0 + $0x80] ss:$16 sps:$4 sm:$0xff]   ;;  %v804_v20 = vld [vmem:[%s1180_s0 + $0x88] ss:$16 sps:$4 sm:$0xff]   ;;  %v805_v21 = vld [vmem:[%s1180_s0 + $0xa4] ss:$16 sps:$4 sm:$0xff]  }
   0x8   :  { %453 = vmatprep.subr.bf16.mxu0 %v787_v9  ;;  %506 = vmatprep.subr.bf16.mxu1 %v789_v10  ;;  %v807_v22 = vld [vmem:[%s1180_s0 + $0xac] ss:$16 sps:$4 sm:$0xff]   ;;  %v809_v23 = vld [vmem:[%s1180_s0 + $0xa0] ss:$16 sps:$4 sm:$0xff]   ;;  %v810_v24 = vld [vmem:[%s1180_s0 + $0xa8] ss:$16 sps:$4 sm:$0xff]  }
   0x9   :  { %v811_v25 = vld [vmem:[%s1180_s0 + $0xc4] ss:$16 sps:$4 sm:$0xff]   ;;  %v813_v26 = vld [vmem:[%s1180_s0 + $0xcc] ss:$16 sps:$4 sm:$0xff]   ;;  %v815_v27 = vld [vmem:[%s1180_s0 + $0xc0] ss:$16 sps:$4 sm:$0xff]  }
   0xa   :  { %v816_v28 = vld [vmem:[%s1180_s0 + $0xc8] ss:$16 sps:$4 sm:$0xff]   ;;  %v817_v29 = vld [vmem:[%s1180_s0 + $0xe4] ss:$16 sps:$4 sm:$0xff]   ;;  %v819_v30 = vld [vmem:[%s1180_s0 + $0xec] ss:$16 sps:$4 sm:$0xff]  }
   0xb   :  { %454 = vmatpush1.bf16.msra.mxu0 %v791_v11  ;;  %507 = vmatpush1.bf16.msra.mxu1 %v792_v12  ;;  %v821_v31 = vld [vmem:[%s1180_s0 + $0xe0] ss:$16 sps:$4 sm:$0xff]   ;;  %v822_v32 = vld [vmem:[%s1180_s0 + $0xe8] ss:$16 sps:$4 sm:$0xff]   ;;  %v823_v33 = vld [vmem:[%s1180_s0 + $0x104] ss:$16 sps:$4 sm:$0xff]  }
   0xc   :  { %455 = vmatprep.subr.bf16.mxu0 %v793_v13  ;;  %508 = vmatprep.subr.bf16.mxu1 %v795_v14  ;;  %v825_v34 = vld [vmem:[%s1180_s0 + $0x10c] ss:$16 sps:$4 sm:$0xff]   ;;  %v827_v35 = vld [vmem:[%s1180_s0 + $0x100] ss:$16 sps:$4 sm:$0xff]   ;;  %v828_v36 = vld [vmem:[%s1180_s0 + $0x108] ss:$16 sps:$4 sm:$0xff]  }
   0xd   :  { %v829_v37 = vld [vmem:[%s1180_s0 + $0x124] ss:$16 sps:$4 sm:$0xff]   ;;  %v831_v38 = vld [vmem:[%s1180_s0 + $0x12c] ss:$16 sps:$4 sm:$0xff]   ;;  %v833_v39 = vld [vmem:[%s1180_s0 + $0x120] ss:$16 sps:$4 sm:$0xff]  }
   0xe   :  { %v834_v40 = vld [vmem:[%s1180_s0 + $0x128] ss:$16 sps:$4 sm:$0xff]   ;;  %v835_v41 = vld [vmem:[%s1180_s0 + $0x144] ss:$16 sps:$4 sm:$0xff]   ;;  %v837_v42 = vld [vmem:[%s1180_s0 + $0x14c] ss:$16 sps:$4 sm:$0xff]  }
   0xf   :  { %456 = vmatpush1.bf16.msra.mxu0 %v797_v15  ;;  %509 = vmatpush1.bf16.msra.mxu1 %v798_v16  ;;  %v839_v43 = vld [vmem:[%s1180_s0 + $0x140] ss:$16 sps:$4 sm:$0xff]   ;;  %v840_v44 = vld [vmem:[%s1180_s0 + $0x148] ss:$16 sps:$4 sm:$0xff]   ;;  %v841_v45 = vld [vmem:[%s1180_s0 + $0x164] ss:$16 sps:$4 sm:$0xff]  }
  0x10   :  { %457 = vmatprep.subr.bf16.mxu0 %v799_v17  ;;  %510 = vmatprep.subr.bf16.mxu1 %v801_v18  ;;  %v843_v46 = vld [vmem:[%s1180_s0 + $0x16c] ss:$16 sps:$4 sm:$0xff]   ;;  %v845_v47 = vld [vmem:[%s1180_s0 + $0x160] ss:$16 sps:$4 sm:$0xff]   ;;  %v846_v49 = vld [vmem:[%s1180_s0 + $0x168] ss:$16 sps:$4 sm:$0xff]  }
  0x11   :  { %v873_v48 = vld [vmem:[%s1181_s1 + $0x4] ss:$8 sps:$4 sm:$0xff]   ;;  %v87_v53 = vld [vmem:[%s1182_s2 + $0x10] sm:$0xff]  ;;  %v852_v55 = vld [vmem:[%s1180_s0 + $0x188] ss:$16 sps:$4 sm:$0xff]  }
  0x12   :  { %v847_v50 = vld [vmem:[%s1180_s0 + $0x184] ss:$16 sps:$4 sm:$0xff]   ;;  %v849_v51 = vld [vmem:[%s1180_s0 + $0x18c] ss:$16 sps:$4 sm:$0xff]   ;;  %481 = vmatprep.mubr.bf16.mxu0 %v873_v48  ;;  %534 = vmatprep.mubr.bf16.mxu1 %v873_v48  ;;  %v851_v54 = vld [vmem:[%s1180_s0 + $0x180] ss:$16 sps:$4 sm:$0xff]  }
  0x13   :  { %458 = vmatpush1.bf16.msra.mxu0 %v803_v19  ;;  %511 = vmatpush1.bf16.msra.mxu1 %v804_v20  ;;  %v85_v52 = vld [vmem:[%s1182_s2] sm:$0xff]  ;;  %v86_v56 = vld [vmem:[%s1182_s2 + $0x8] sm:$0xff]  ;;  %v88_v57 = vld [vmem:[%s1182_s2 + $0x18] sm:$0xff] }
  0x14   :  { %459 = vmatprep.subr.bf16.mxu0 %v805_v21  ;;  %512 = vmatprep.subr.bf16.mxu1 %v807_v22  ;;  %v853_v58 = vld [vmem:[%s1180_s0 + $0x1a4] ss:$16 sps:$4 sm:$0xff]   ;;  %v855_v59 = vld [vmem:[%s1180_s0 + $0x1ac] ss:$16 sps:$4 sm:$0xff]   ;;  %v857_v60 = vld [vmem:[%s1180_s0 + $0x1a0] ss:$16 sps:$4 sm:$0xff]  }
  0x15   :  { %91 = vperm.xlu0 %773, %v85_v52   ;;  %101 = vperm.xlu1 %774, %v87_v53   ;;  %v858_v61 = vld [vmem:[%s1180_s0 + $0x1a8] ss:$16 sps:$4 sm:$0xff]   ;;  %v859_v62 = vld [vmem:[%s1180_s0 + $0x1c4] ss:$16 sps:$4 sm:$0xff]   ;;  %v861_v63 = vld [vmem:[%s1180_s0 + $0x1cc] ss:$16 sps:$4 sm:$0xff]  }
  0x16   :  { %v863_v0 = vld [vmem:[%s1180_s0 + $0x1c0] ss:$16 sps:$4 sm:$0xff]   ;;  %v864_v1 = vld [vmem:[%s1180_s0 + $0x1c8] ss:$16 sps:$4 sm:$0xff]   ;;  %v865_v2 = vld [vmem:[%s1180_s0 + $0x1e4] ss:$16 sps:$4 sm:$0xff]  }
  0x17   :  { %460 = vmatpush1.bf16.msra.mxu0 %v809_v23  ;;  %513 = vmatpush1.bf16.msra.mxu1 %v810_v24  ;;  %v867_v3 = vld [vmem:[%s1180_s0 + $0x1ec] ss:$16 sps:$4 sm:$0xff]   ;;  %v869_v4 = vld [vmem:[%s1180_s0 + $0x1e0] ss:$16 sps:$4 sm:$0xff]   ;;  %v870_v5 = vld [vmem:[%s1180_s0 + $0x1e8] ss:$16 sps:$4 sm:$0xff]  }
  0x18   :  { %461 = vmatprep.subr.bf16.mxu0 %v811_v25  ;;  %514 = vmatprep.subr.bf16.mxu1 %v813_v26  ;;  %v871_v6 = vld [vmem:[%s1181_s1] ss:$8 sps:$4 sm:$0xff]   ;;  %v874_v7 = vld [vmem:[%s1181_s1 + $0x14] ss:$8 sps:$4 sm:$0xff]   ;;  %v876_v8 = vld [vmem:[%s1181_s1 + $0x10] ss:$8 sps:$4 sm:$0xff]  }
  0x19   :  { %96 = vperm.xlu0 %773, %v86_v56   ;;  %106 = vperm.xlu1 %774, %v88_v57  }
  0x1b   :  { %462 = vmatpush1.bf16.msra.mxu0 %v815_v27  ;;  %515 = vmatpush1.bf16.msra.mxu1 %v816_v28 }
  0x1c   :  { %463 = vmatprep.subr.bf16.mxu0 %v817_v29  ;;  %516 = vmatprep.subr.bf16.mxu1 %v819_v30 }
  0x1f   :  { %464 = vmatpush1.bf16.msra.mxu0 %v821_v31  ;;  %517 = vmatpush1.bf16.msra.mxu1 %v822_v32 }
  0x20   :  { %465 = vmatprep.subr.bf16.mxu0 %v823_v33  ;;  %518 = vmatprep.subr.bf16.mxu1 %v825_v34 }
  0x23   :  { %466 = vmatpush1.bf16.msra.mxu0 %v827_v35  ;;  %519 = vmatpush1.bf16.msra.mxu1 %v828_v36 }
  0x24   :  { %467 = vmatprep.subr.bf16.mxu0 %v829_v37  ;;  %520 = vmatprep.subr.bf16.mxu1 %v831_v38 }
  0x27   :  { %468 = vmatpush1.bf16.msra.mxu0 %v833_v39  ;;  %521 = vmatpush1.bf16.msra.mxu1 %v834_v40 }
  0x28   :  { %469 = vmatprep.subr.bf16.mxu0 %v835_v41  ;;  %522 = vmatprep.subr.bf16.mxu1 %v837_v42 }
  0x2b   :  { %470 = vmatpush1.bf16.msra.mxu0 %v839_v43  ;;  %523 = vmatpush1.bf16.msra.mxu1 %v840_v44 }
  0x2c   :  { %471 = vmatprep.subr.bf16.mxu0 %v841_v45  ;;  %524 = vmatprep.subr.bf16.mxu1 %v843_v46 }
  0x2f   :  { %472 = vmatpush1.bf16.msra.mxu0 %v845_v47  ;;  %525 = vmatpush1.bf16.msra.mxu1 %v846_v49 }
  0x30   :  { %473 = vmatprep.subr.bf16.mxu0 %v847_v50  ;;  %526 = vmatprep.subr.bf16.mxu1 %v849_v51 }
  0x33   :  { %474 = vmatpush1.bf16.msra.mxu0 %v851_v54  ;;  %527 = vmatpush1.bf16.msra.mxu1 %v852_v55 }
  0x34   :  { %475 = vmatprep.subr.bf16.mxu0 %v853_v58  ;;  %528 = vmatprep.subr.bf16.mxu1 %v855_v59 }
  0x37   :  { %476 = vmatpush1.bf16.msra.mxu0 %v857_v60  ;;  %529 = vmatpush1.bf16.msra.mxu1 %v858_v61 }
  0x38   :  { %477 = vmatprep.subr.bf16.mxu0 %v859_v62  ;;  %530 = vmatprep.subr.bf16.mxu1 %v861_v63 }
  0x3b   :  { %478 = vmatpush1.bf16.msra.mxu0 %v863_v0  ;;  %531 = vmatpush1.bf16.msra.mxu1 %v864_v1 }
  0x3c   :  { %479 = vmatprep.subr.bf16.mxu0 %v865_v2  ;;  %532 = vmatprep.subr.bf16.mxu1 %v867_v3 }
  0x3f   :  { %480 = vmatpush1.bf16.msra.mxu0 %v869_v4  ;;  %533 = vmatpush1.bf16.msra.mxu1 %v870_v5 }
  0x42   :  { %482 = vmatmul.mubr.bf16.vlgmr.msra.gmra.mrb[0].mxu0 %v871_v6  ;;  %535 = vmatmul.mubr.bf16.vlgmr.msra.gmra.mrb[0].mxu1 %v871_v6 }
  0x43   :  { %491 = vmatprep.mubr.bf16.mxu0 %v874_v7  ;;  %544 = vmatprep.mubr.bf16.mxu1 %v874_v7 }
  0x4a   :  { %492 = vmatmul.mubr.bf16.gmra.mrb[4].mxu0 %v876_v8  ;;  %545 = vmatmul.mubr.bf16.gmra.mrb[4].mxu1 %v876_v8 }
  0x94   :  { %v92_v9 = vpop.permute.xlu0 %91  ;;  %v102_v11 = vpop.permute.xlu1 %101 }
  0x98   :  { %v97_v10 = vpop.permute.xlu0 %96  ;;  %v107_v41 = vpop.permute.xlu1 %106 }
 0x115   :  { %v483_v12 = vpop.f32.mrb[0].mxu0  ;;  %v536_v13 = vpop.f32.mrb[0].mxu1 }
 0x116   :  { %v484_v14 = vadd.f32 %v483_v12, %v92_v9  ;;  %v537_v15 = vadd.f32 %v536_v13, %v92_v9  ;;  %v485_v16 = vpop.f32.mrb[1].mxu0  ;;  %v538_v17 = vpop.f32.mrb[1].mxu1 }
 0x117   :  { %v486_v18 = vadd.f32 %v485_v16, %v92_v9  ;;  %v539_v19 = vadd.f32 %v538_v17, %v92_v9  ;;  %v487_v20 = vpop.f32.mrb[2].mxu0  ;;  %v540_v21 = vpop.f32.mrb[2].mxu1 }
 0x118   :  { %v636_v22 = vmul.f32 %v484_v14, %v484_v14  ;;  %v488_v23 = vadd.f32 %v487_v20, %v97_v10  ;;  %v541_v24 = vadd.f32 %v540_v21, %v97_v10  ;;  %v489_v25 = vpop.f32.mrb[3].mxu0  ;;  %v542_v26 = vpop.f32.mrb[3].mxu1  ;;  %v638_v34 = vmul.f32 %v537_v15, %v537_v15 }
 0x119   :  { %v764_v27 = vpack.c.bf16 %v486_v18, %v484_v14  ;;  %v611_v28 = vadd.f32 %v486_v18, %v484_v14  ;;  %v637_v29 = vmul.f32 %v486_v18, %v486_v18  ;;  %v765_v30 = vpack.c.bf16 %v539_v19, %v537_v15 }
 0x11a   :  { %v640_v31 = vmul.f32 %v488_v23, %v488_v23  ;;  %v490_v32 = vadd.f32 %v489_v25, %v97_v10  ;;  %v543_v33 = vadd.f32 %v542_v26, %v97_v10  ;;  %v639_v45 = vmul.f32 %v539_v19, %v539_v19 }
 0x11b   :  { %603 = vst [vmem:[%s1183_s3] sm:$0xff] %v764_v27  ;;  %604 = vst [vmem:[%s1183_s3 + $0x8] sm:$0xff] %v765_v30  ;;  %v612_v35 = vadd.f32 %v611_v28, %v537_v15  ;;  %v652_v36 = vadd.f32 %v637_v29, %v636_v22  ;;  %v642_v58 = vmul.f32 %v541_v24, %v541_v24 }
 0x11c   :  { %v766_v37 = vpack.c.bf16 %v490_v32, %v488_v23  ;;  %v616_v38 = vadd.f32 %v490_v32, %v488_v23  ;;  %v641_v39 = vmul.f32 %v490_v32, %v490_v32  ;;  %v767_v40 = vpack.c.bf16 %v543_v33, %v541_v24 }
 0x11d   :  { %v493_v42 = vpop.f32.mrb[4].mxu0  ;;  %v546_v43 = vpop.f32.mrb[4].mxu1  ;;  %v613_v44 = vadd.f32 %v612_v35, %v539_v19  ;;  %v653_v46 = vadd.f32 %v652_v36, %v638_v34  ;;  %v643_v8 = vmul.f32 %v543_v33, %v543_v33 }
 0x11e   :  { %605 = vst [vmem:[%s1183_s3 + $0x10] sm:$0xff] %v766_v37  ;;  %606 = vst [vmem:[%s1183_s3 + $0x18] sm:$0xff] %v767_v40  ;;  %v494_v47 = vadd.f32 %v493_v42, %v102_v11  ;;  %v547_v48 = vadd.f32 %v546_v43, %v102_v11  ;;  %v495_v49 = vpop.f32.mrb[5].mxu0  ;;  %v548_v50 = vpop.f32.mrb[5].mxu1  ;;  %v617_v51 = vadd.f32 %v616_v38, %v541_v24 }
 0x11f   :  { %v657_v52 = vadd.f32 %v641_v39, %v640_v31  ;;  %v496_v53 = vadd.f32 %v495_v49, %v102_v11  ;;  %v549_v54 = vadd.f32 %v548_v50, %v102_v11  ;;  %v497_v55 = vpop.f32.mrb[6].mxu0  ;;  %v550_v56 = vpop.f32.mrb[6].mxu1  ;;  %614 = vadd.xlane.f32.xlu0 %v613_v44  ;;  %v654_v57 = vadd.f32 %v653_v46, %v639_v45 }
 0x120   :  { %v644_v59 = vmul.f32 %v494_v47, %v494_v47  ;;  %v498_v60 = vadd.f32 %v497_v55, %v107_v41  ;;  %v551_v61 = vadd.f32 %v550_v56, %v107_v41  ;;  %v499_v62 = vpop.f32.mrb[7].mxu0  ;;  %v552_v63 = vpop.f32.mrb[7].mxu1  ;;  %v618_v7 = vadd.f32 %v617_v51, %v543_v33 }
 0x121   :  { %v768_v0 = vpack.c.bf16 %v496_v53, %v494_v47  ;;  %v621_v1 = vadd.f32 %v496_v53, %v494_v47  ;;  %v645_v2 = vmul.f32 %v496_v53, %v496_v53  ;;  %v769_v3 = vpack.c.bf16 %v549_v54, %v547_v48 }
 0x122   :  { %v648_v4 = vmul.f32 %v498_v60, %v498_v60  ;;  %v500_v5 = vadd.f32 %v499_v62, %v107_v41  ;;  %v553_v6 = vadd.f32 %v552_v63, %v107_v41  ;;  %v658_v9 = vadd.f32 %v657_v52, %v642_v58  ;;  %619 = vadd.xlane.f32.xlu1 %v618_v7 }
 0x123   :  { %607 = vst [vmem:[%s1183_s3 + $0x20] sm:$0xff] %v768_v0  ;;  %608 = vst [vmem:[%s1183_s3 + $0x28] sm:$0xff] %v769_v3  ;;  %v622_v10 = vadd.f32 %v621_v1, %v547_v48  ;;  %v646_v15 = vmul.f32 %v547_v48, %v547_v48  ;;  %v662_v18 = vadd.f32 %v645_v2, %v644_v59 }
 0x124   :  { %v770_v11 = vpack.c.bf16 %v500_v5, %v498_v60  ;;  %v626_v12 = vadd.f32 %v500_v5, %v498_v60  ;;  %v649_v13 = vmul.f32 %v500_v5, %v500_v5  ;;  %v771_v14 = vpack.c.bf16 %v553_v6, %v551_v61 }
 0x125   :  { %v659_v16 = vadd.f32 %v658_v9, %v643_v8  ;;  %v623_v17 = vadd.f32 %v622_v10, %v549_v54  ;;  %v650_v19 = vmul.f32 %v551_v61, %v551_v61  ;;  %v647_v22 = vmul.f32 %v549_v54, %v549_v54 }
 0x126   :  { %609 = vst [vmem:[%s1183_s3 + $0x30] sm:$0xff] %v770_v11  ;;  %610 = vst [vmem:[%s1183_s3 + $0x38] sm:$0xff] %v771_v14  ;;  %v627_v20 = vadd.f32 %v626_v12, %v551_v61  ;;  %v667_v21 = vadd.f32 %v649_v13, %v648_v4  ;;  %v663_v23 = vadd.f32 %v662_v18, %v646_v15  ;;  %655 = vadd.xlane.f32.xlu1 %v654_v57 }
 0x127   :  { %660 = vadd.xlane.f32.xlu0 %v659_v16  ;;  %v651_v25 = vmul.f32 %v553_v6, %v553_v6 }
 0x128   :  { %v628_v24 = vadd.f32 %v627_v20, %v553_v6  ;;  %v668_v26 = vadd.f32 %v667_v21, %v650_v19  ;;  %v664_v27 = vadd.f32 %v663_v23, %v647_v22 }
 0x12a   :  { %v669_v28 = vadd.f32 %v668_v26, %v651_v25  ;;  %665 = vadd.xlane.f32.xlu1 %v664_v27 }
 0x12b   :  { %624 = vadd.xlane.f32.xlu0 %v623_v17 }
 0x12f   :  { %629 = vadd.xlane.f32.xlu0 %v628_v24 }
 0x133   :  { %670 = vadd.xlane.f32.xlu0 %v669_v28 }
 0x1ac   :  { %v615_v29 = vpop.xlane.xlu0 %614 }
 0x1ad   :  { %632 = vst.msk [vmem:[%s1184_s4] sm:$0xff] %vm631_vm0, %v615_v29 }
 0x1af   :  { %v620_v30 = vpop.xlane.xlu1 %619 }
 0x1b0   :  { %633 = vst.msk [vmem:[%s1184_s4 + $0x8] sm:$0xff] %vm631_vm0, %v620_v30 }
 0x1b3   :  { %v656_v32 = vpop.xlane.xlu1 %655 }
 0x1b4   :  { %v661_v31 = vpop.xlane.xlu0 %660  ;;  %672 = vst.msk [vmem:[%s1185_s5] sm:$0xff] %vm631_vm0, %v656_v32 }
 0x1b5   :  { %673 = vst.msk [vmem:[%s1185_s5 + $0x8] sm:$0xff] %vm631_vm0, %v661_v31 }
 0x1b7   :  { %v666_v34 = vpop.xlane.xlu1 %665 }
 0x1b8   :  { %v625_v33 = vpop.xlane.xlu0 %624  ;;  %674 = vst.msk [vmem:[%s1185_s5 + $0x10] sm:$0xff] %vm631_vm0, %v666_v34 }
 0x1b9   :  { %634 = vst.msk [vmem:[%s1184_s4 + $0x10] sm:$0xff] %vm631_vm0, %v625_v33 }
 0x1bc   :  { %v630_v35 = vpop.xlane.xlu0 %629 }
 0x1bd   :  { %635 = vst.msk [vmem:[%s1184_s4 + $0x18] sm:$0xff] %vm631_vm0, %v630_v35 }
 0x1c0   :  { %v671_v36 = vpop.xlane.xlu0 %670 }
 0x1c1   :  { %675 = vst.msk [vmem:[%s1185_s5 + $0x18] sm:$0xff] %vm631_vm0, %v671_v36 }

// kernel: discriminator_forward.6
= control target key start
LH: loop header
LB: loop body
LE: loop exit
PB: predicated region body
PF: predicated region fallthrough
CT: control target
= control target key end

     0   :  { %v883_v1 = vmov 0   ;;  %vm604_vm0 = vcmask 7168   ;;  %s1158_s0 = inlined_call_operand.vmem [shape: bf16[512,128], index: 0, kind: input, shape index: {}]   ;;  %s1159_s1 = inlined_call_operand.vmem [shape: bf16[64,512], index: 1, kind: input, shape index: {}]   ;;  %s1160_s2 = inlined_call_operand.vmem [shape: f32[64,1], index: 2, kind: input, shape index: {}]   ;;  %s1161_s3 = inlined_call_operand.vmem [shape: bf16[64,128], index: 3, kind: output, shape index: {0}]   ;;  %s1162_s4 = inlined_call_operand.vmem [shape: f32[1,64,1], index: 4, kind: output, shape index: {1}]   ;;  %s1163_s5 = inlined_call_operand.vmem [shape: f32[1,64,1], index: 5, kind: output, shape index: {2}]  }
   0x1   :  { %v827_v0 = vld [vmem:[%s1158_s0 + $0x40] sm:$0xff]   ;;  %825 = vset.pattern.permute.xlu0 %v883_v1  ;;  %826 = vset.pattern.permute.xlu1 %v883_v1  ;;  %v831_v5 = vld [vmem:[%s1158_s0 + $0x48] sm:$0xff]   ;;  %v835_v9 = vld [vmem:[%s1158_s0 + $0x50] sm:$0xff]  }
   0x2   :  { %v828_v2 = vld [vmem:[%s1158_s0 + $0xc0] sm:$0xff]   ;;  %744 = vmatprep.subr.bf16.mxu0 %v827_v0  ;;  %v832_v6 = vld [vmem:[%s1158_s0 + $0xc8] sm:$0xff]   ;;  %v836_v10 = vld [vmem:[%s1158_s0 + $0xd0] sm:$0xff]  }
   0x3   :  { %v829_v3 = vld [vmem:[%s1158_s0] sm:$0xff]   ;;  %784 = vmatprep.subr.bf16.mxu1 %v828_v2  ;;  %v833_v7 = vld [vmem:[%s1158_s0 + $0x8] sm:$0xff]   ;;  %v837_v11 = vld [vmem:[%s1158_s0 + $0x10] sm:$0xff]  }
   0x4   :  { %v830_v4 = vld [vmem:[%s1158_s0 + $0x80] sm:$0xff]   ;;  %745 = vmatpush3.bf16.msra.mxu0 %v829_v3  ;;  %v834_v8 = vld [vmem:[%s1158_s0 + $0x88] sm:$0xff]   ;;  %v838_v12 = vld [vmem:[%s1158_s0 + $0x90] sm:$0xff]  }
   0x5   :  { %785 = vmatpush3.bf16.msra.mxu1 %v830_v4  ;;  %746 = vmatprep.subr.bf16.mxu0 %v831_v5  ;;  %v839_v13 = vld [vmem:[%s1158_s0 + $0x58] sm:$0xff]   ;;  %v843_v17 = vld [vmem:[%s1158_s0 + $0x60] sm:$0xff]   ;;  %v847_v21 = vld [vmem:[%s1158_s0 + $0x68] sm:$0xff]  }
   0x6   :  { %786 = vmatprep.subr.bf16.mxu1 %v832_v6  ;;  %v840_v14 = vld [vmem:[%s1158_s0 + $0xd8] sm:$0xff]   ;;  %v844_v18 = vld [vmem:[%s1158_s0 + $0xe0] sm:$0xff]   ;;  %v848_v22 = vld [vmem:[%s1158_s0 + $0xe8] sm:$0xff]  }
   0x7   :  { %v841_v15 = vld [vmem:[%s1158_s0 + $0x18] sm:$0xff]   ;;  %v845_v19 = vld [vmem:[%s1158_s0 + $0x20] sm:$0xff]   ;;  %v849_v23 = vld [vmem:[%s1158_s0 + $0x28] sm:$0xff]  }
   0x8   :  { %747 = vmatpush3.bf16.msra.mxu0 %v833_v7  ;;  %v842_v16 = vld [vmem:[%s1158_s0 + $0x98] sm:$0xff]   ;;  %v846_v20 = vld [vmem:[%s1158_s0 + $0xa0] sm:$0xff]   ;;  %v850_v24 = vld [vmem:[%s1158_s0 + $0xa8] sm:$0xff]  }
   0x9   :  { %787 = vmatpush3.bf16.msra.mxu1 %v834_v8  ;;  %748 = vmatprep.subr.bf16.mxu0 %v835_v9  ;;  %v851_v25 = vld [vmem:[%s1158_s0 + $0x70] sm:$0xff]   ;;  %v855_v29 = vld [vmem:[%s1158_s0 + $0x78] sm:$0xff]   ;;  %v98_v43 = vld [vmem:[%s1160_s2] sm:$0xff] }
   0xa   :  { %788 = vmatprep.subr.bf16.mxu1 %v836_v10  ;;  %v852_v26 = vld [vmem:[%s1158_s0 + $0xf0] sm:$0xff]   ;;  %v856_v30 = vld [vmem:[%s1158_s0 + $0xf8] sm:$0xff]   ;;  %108 = vperm.xlu0 %825, %v98_v43   ;;  %v99_v45 = vld [vmem:[%s1160_s2 + $0x8] sm:$0xff] }
   0xb   :  { %v853_v27 = vld [vmem:[%s1158_s0 + $0x30] sm:$0xff]   ;;  %v857_v31 = vld [vmem:[%s1158_s0 + $0x38] sm:$0xff]   ;;  %v102_v48 = vld [vmem:[%s1160_s2 + $0x20] sm:$0xff] }
   0xc   :  { %749 = vmatpush3.bf16.msra.mxu0 %v837_v11  ;;  %v854_v28 = vld [vmem:[%s1158_s0 + $0xb0] sm:$0xff]   ;;  %v858_v32 = vld [vmem:[%s1158_s0 + $0xb8] sm:$0xff]   ;;  %v103_v51 = vld [vmem:[%s1160_s2 + $0x28] sm:$0xff] }
   0xd   :  { %789 = vmatpush3.bf16.msra.mxu1 %v838_v12  ;;  %750 = vmatprep.subr.bf16.mxu0 %v839_v13  ;;  %v859_v33 = vld [vmem:[%s1159_s1] ss:$16 sps:$4 sm:$0xff]   ;;  %v861_v34 = vld [vmem:[%s1159_s1 + $0x4] ss:$16 sps:$4 sm:$0xff]   ;;  %v862_v35 = vld [vmem:[%s1159_s1 + $0x8] ss:$16 sps:$4 sm:$0xff]  }
   0xe   :  { %790 = vmatprep.subr.bf16.mxu1 %v840_v14  ;;  %v864_v36 = vld [vmem:[%s1159_s1 + $0xc] ss:$16 sps:$4 sm:$0xff]   ;;  %450 = vmatprep.mubr.bf16.mxu0 %v861_v34  ;;  %v865_v37 = vld [vmem:[%s1159_s1 + $0x24] ss:$16 sps:$4 sm:$0xff]   ;;  %v869_v39 = vld [vmem:[%s1159_s1 + $0x20] ss:$16 sps:$4 sm:$0xff]  }
   0xf   :  { %515 = vmatprep.mubr.bf16.mxu1 %v864_v36  ;;  %v867_v38 = vld [vmem:[%s1159_s1 + $0x2c] ss:$16 sps:$4 sm:$0xff]   ;;  %v870_v40 = vld [vmem:[%s1159_s1 + $0x28] ss:$16 sps:$4 sm:$0xff]   ;;  %v871_v41 = vld [vmem:[%s1159_s1 + $0x44] ss:$16 sps:$4 sm:$0xff]   ;;  %113 = vperm.xlu0 %825, %v99_v45  }
  0x10   :  { %751 = vmatpush3.bf16.msra.mxu0 %v841_v15  ;;  %v874_v42 = vld [vmem:[%s1159_s1 + $0x4c] ss:$16 sps:$4 sm:$0xff]   ;;  %v100_v44 = vld [vmem:[%s1160_s2 + $0x10] sm:$0xff]  ;;  %v876_v49 = vld [vmem:[%s1159_s1 + $0x48] ss:$16 sps:$4 sm:$0xff]  }
  0x11   :  { %791 = vmatpush3.bf16.msra.mxu1 %v842_v16  ;;  %752 = vmatprep.subr.bf16.mxu0 %v843_v17  ;;  %v101_v46 = vld [vmem:[%s1160_s2 + $0x18] sm:$0xff]  ;;  %v873_v47 = vld [vmem:[%s1159_s1 + $0x40] ss:$16 sps:$4 sm:$0xff]   ;;  %v877_v50 = vld [vmem:[%s1159_s1 + $0x64] ss:$16 sps:$4 sm:$0xff]  }
  0x12   :  { %792 = vmatprep.subr.bf16.mxu1 %v844_v18  ;;  %118 = vperm.xlu1 %826, %v100_v44   ;;  %v880_v52 = vld [vmem:[%s1159_s1 + $0x6c] ss:$16 sps:$4 sm:$0xff]   ;;  %v104_v53 = vld [vmem:[%s1160_s2 + $0x30] sm:$0xff]  ;;  %v882_v56 = vld [vmem:[%s1159_s1 + $0x68] ss:$16 sps:$4 sm:$0xff]  }
  0x13   :  { %128 = vperm.xlu0 %825, %v102_v48   ;;  %v105_v54 = vld [vmem:[%s1160_s2 + $0x38] sm:$0xff]  ;;  %v879_v55 = vld [vmem:[%s1159_s1 + $0x60] ss:$16 sps:$4 sm:$0xff]  }
  0x14   :  { %753 = vmatpush3.bf16.msra.mxu0 %v845_v19 }
  0x15   :  { %793 = vmatpush3.bf16.msra.mxu1 %v846_v20  ;;  %754 = vmatprep.subr.bf16.mxu0 %v847_v21 }
  0x16   :  { %794 = vmatprep.subr.bf16.mxu1 %v848_v22  ;;  %123 = vperm.xlu1 %826, %v101_v46  }
  0x17   :  { %138 = vperm.xlu0 %825, %v104_v53  }
  0x18   :  { %755 = vmatpush3.bf16.msra.mxu0 %v849_v23 }
  0x19   :  { %795 = vmatpush3.bf16.msra.mxu1 %v850_v24  ;;  %756 = vmatprep.subr.bf16.mxu0 %v851_v25 }
  0x1a   :  { %796 = vmatprep.subr.bf16.mxu1 %v852_v26  ;;  %133 = vperm.xlu1 %826, %v103_v51  }
  0x1c   :  { %757 = vmatpush3.bf16.msra.mxu0 %v853_v27 }
  0x1d   :  { %797 = vmatpush3.bf16.msra.mxu1 %v854_v28  ;;  %758 = vmatprep.subr.bf16.mxu0 %v855_v29 }
  0x1e   :  { %798 = vmatprep.subr.bf16.mxu1 %v856_v30  ;;  %143 = vperm.xlu1 %826, %v105_v54  }
  0x20   :  { %759 = vmatpush3.bf16.msra.mxu0 %v857_v31 }
  0x21   :  { %799 = vmatpush3.bf16.msra.mxu1 %v858_v32 }
  0x23   :  { %451 = vmatmul.mubr.bf16.vlgmr.msra.gmra.mrb[0].mxu0 %v859_v33 }
  0x24   :  { %516 = vmatmul.mubr.bf16.vlgmr.msra.gmra.mrb[0].mxu1 %v862_v35  ;;  %458 = vmatprep.mubr.bf16.mxu0 %v865_v37 }
  0x25   :  { %523 = vmatprep.mubr.bf16.mxu1 %v867_v38 }
  0x2b   :  { %459 = vmatmul.mubr.bf16.gmra.mrb[4].mxu0 %v869_v39 }
  0x2c   :  { %524 = vmatmul.mubr.bf16.gmra.mrb[4].mxu1 %v870_v40  ;;  %466 = vmatprep.mubr.bf16.mxu0 %v871_v41 }
  0x2d   :  { %531 = vmatprep.mubr.bf16.mxu1 %v874_v42 }
  0x33   :  { %467 = vmatmul.mubr.bf16.gmra.mrb[8].mxu0 %v873_v47 }
  0x34   :  { %532 = vmatmul.mubr.bf16.gmra.mrb[8].mxu1 %v876_v49  ;;  %474 = vmatprep.mubr.bf16.mxu0 %v877_v50 }
  0x35   :  { %539 = vmatprep.mubr.bf16.mxu1 %v880_v52 }
  0x3b   :  { %475 = vmatmul.mubr.bf16.gmra.mrb[12].mxu0 %v879_v55 }
  0x3c   :  { %540 = vmatmul.mubr.bf16.gmra.mrb[12].mxu1 %v882_v56 }
  0x89   :  { %v109_v57 = vpop.permute.xlu0 %108 }
  0x8e   :  { %v114_v6 = vpop.permute.xlu0 %113 }
  0x91   :  { %v119_v10 = vpop.permute.xlu1 %118 }
  0x92   :  { %v129_v31 = vpop.permute.xlu0 %128 }
  0x95   :  { %v124_v27 = vpop.permute.xlu1 %123 }
  0x96   :  { %v139_v52 = vpop.permute.xlu0 %138 }
  0x99   :  { %v134_v47 = vpop.permute.xlu1 %133 }
  0xf6   :  { %v760_v58 = vpop.f32.mrb[0].mxu0 }
  0xf7   :  { %v800_v59 = vpop.f32.mrb[0].mxu1  ;;  %v761_v60 = vpop.f32.mrb[1].mxu0 }
  0xf8   :  { %v762_v61 = vadd.f32 %v761_v60, %v760_v58  ;;  %v801_v62 = vpop.f32.mrb[1].mxu1  ;;  %v763_v63 = vpop.f32.mrb[2].mxu0 }
  0xf9   :  { %v802_v0 = vadd.f32 %v801_v62, %v800_v59  ;;  %v803_v1 = vpop.f32.mrb[2].mxu1  ;;  %v764_v2 = vpop.f32.mrb[3].mxu0 }
  0xfa   :  { %v453_v3 = vadd.f32 %v762_v61, %v109_v57  ;;  %v765_v4 = vadd.f32 %v764_v2, %v763_v63  ;;  %v804_v5 = vpop.f32.mrb[3].mxu1 }
  0xfb   :  { %v805_v7 = vadd.f32 %v804_v5, %v803_v1 }
  0xfc   :  { %v518_v8 = vadd.f32 %v802_v0, %v453_v3  ;;  %v456_v9 = vadd.f32 %v765_v4, %v114_v6  ;;  %v144_v4 = vpop.permute.xlu1 %143 }
  0xfe   :  { %v521_v11 = vadd.f32 %v805_v7, %v456_v9  ;;  %v766_v12 = vpop.f32.mrb[4].mxu0  ;;  %588 = vadd.xlane.f32.xlu0 %v518_v8  ;;  %v613_v26 = vmul.f32 %v518_v8, %v518_v8 }
  0xff   :  { %v806_v13 = vpop.f32.mrb[4].mxu1  ;;  %v767_v14 = vpop.f32.mrb[5].mxu0 }
 0x100   :  { %v724_v15 = vpack.c.bf16 %v521_v11, %v518_v8  ;;  %v768_v16 = vadd.f32 %v767_v14, %v766_v12  ;;  %v807_v17 = vpop.f32.mrb[5].mxu1  ;;  %v769_v18 = vpop.f32.mrb[6].mxu0  ;;  %590 = vadd.xlane.f32.xlu1 %v521_v11  ;;  %v614_v19 = vmul.f32 %v521_v11, %v521_v11 }
 0x101   :  { %v808_v20 = vadd.f32 %v807_v17, %v806_v13  ;;  %v809_v21 = vpop.f32.mrb[6].mxu1  ;;  %v770_v22 = vpop.f32.mrb[7].mxu0 }
 0x102   :  { %725 = vst [vmem:[%s1161_s3] sm:$0xff] %v724_v15   ;;  %v461_v23 = vadd.f32 %v768_v16, %v119_v10  ;;  %v771_v24 = vadd.f32 %v770_v22, %v769_v18  ;;  %v810_v25 = vpop.f32.mrb[7].mxu1  ;;  %623 = vadd.xlane.f32.xlu0 %v614_v19 }
 0x103   :  { %v811_v28 = vadd.f32 %v810_v25, %v809_v21 }
 0x104   :  { %v526_v29 = vadd.f32 %v808_v20, %v461_v23  ;;  %v464_v30 = vadd.f32 %v771_v24, %v124_v27  ;;  %621 = vadd.xlane.f32.xlu1 %v613_v26 }
 0x106   :  { %v529_v32 = vadd.f32 %v811_v28, %v464_v30  ;;  %v772_v33 = vpop.f32.mrb[8].mxu0  ;;  %592 = vadd.xlane.f32.xlu0 %v526_v29  ;;  %v615_v34 = vmul.f32 %v526_v29, %v526_v29 }
 0x107   :  { %v773_v35 = vpop.f32.mrb[9].mxu0  ;;  %v812_v36 = vpop.f32.mrb[8].mxu1 }
 0x108   :  { %v729_v37 = vpack.c.bf16 %v529_v32, %v526_v29  ;;  %v774_v38 = vadd.f32 %v773_v35, %v772_v33  ;;  %v775_v39 = vpop.f32.mrb[10].mxu0  ;;  %v813_v40 = vpop.f32.mrb[9].mxu1  ;;  %625 = vadd.xlane.f32.xlu1 %v615_v34  ;;  %v616_v51 = vmul.f32 %v529_v32, %v529_v32 }
 0x109   :  { %v814_v41 = vadd.f32 %v813_v40, %v812_v36  ;;  %v776_v42 = vpop.f32.mrb[11].mxu0  ;;  %v815_v43 = vpop.f32.mrb[10].mxu1 }
 0x10a   :  { %741 = vst [vmem:[%s1161_s3 + $0x8] sm:$0xff] %v729_v37   ;;  %v469_v44 = vadd.f32 %v774_v38, %v129_v31  ;;  %v777_v45 = vadd.f32 %v776_v42, %v775_v39  ;;  %v816_v46 = vpop.f32.mrb[11].mxu1  ;;  %594 = vadd.xlane.f32.xlu0 %v529_v32 }
 0x10b   :  { %v817_v48 = vadd.f32 %v816_v46, %v815_v43 }
 0x10c   :  { %v534_v49 = vadd.f32 %v814_v41, %v469_v44  ;;  %v472_v50 = vadd.f32 %v777_v45, %v134_v47 }
 0x10e   :  { %v537_v53 = vadd.f32 %v817_v48, %v472_v50  ;;  %v778_v54 = vpop.f32.mrb[12].mxu0  ;;  %627 = vadd.xlane.f32.xlu0 %v616_v51  ;;  %596 = vadd.xlane.f32.xlu1 %v534_v49  ;;  %v617_v61 = vmul.f32 %v534_v49, %v534_v49 }
 0x10f   :  { %v779_v55 = vpop.f32.mrb[13].mxu0  ;;  %v818_v56 = vpop.f32.mrb[12].mxu1 }
 0x110   :  { %v734_v57 = vpack.c.bf16 %v537_v53, %v534_v49  ;;  %v780_v58 = vadd.f32 %v779_v55, %v778_v54  ;;  %v781_v59 = vpop.f32.mrb[14].mxu0  ;;  %v819_v60 = vpop.f32.mrb[13].mxu1  ;;  %v618_v8 = vmul.f32 %v537_v53, %v537_v53 }
 0x111   :  { %v820_v62 = vadd.f32 %v819_v60, %v818_v56  ;;  %v782_v63 = vpop.f32.mrb[15].mxu0  ;;  %v821_v0 = vpop.f32.mrb[14].mxu1 }
 0x112   :  { %742 = vst [vmem:[%s1161_s3 + $0x10] sm:$0xff] %v734_v57   ;;  %v477_v1 = vadd.f32 %v780_v58, %v139_v52  ;;  %v783_v2 = vadd.f32 %v782_v63, %v781_v59  ;;  %v822_v3 = vpop.f32.mrb[15].mxu1  ;;  %598 = vadd.xlane.f32.xlu0 %v537_v53  ;;  %629 = vadd.xlane.f32.xlu1 %v617_v61 }
 0x113   :  { %v823_v5 = vadd.f32 %v822_v3, %v821_v0 }
 0x114   :  { %v542_v6 = vadd.f32 %v820_v62, %v477_v1  ;;  %v480_v7 = vadd.f32 %v783_v2, %v144_v4 }
 0x116   :  { %v545_v9 = vadd.f32 %v823_v5, %v480_v7  ;;  %631 = vadd.xlane.f32.xlu0 %v618_v8  ;;  %600 = vadd.xlane.f32.xlu1 %v542_v6  ;;  %v619_v11 = vmul.f32 %v542_v6, %v542_v6 }
 0x118   :  { %v739_v10 = vpack.c.bf16 %v545_v9, %v542_v6  ;;  %v620_v12 = vmul.f32 %v545_v9, %v545_v9 }
 0x11a   :  { %743 = vst [vmem:[%s1161_s3 + $0x18] sm:$0xff] %v739_v10   ;;  %602 = vadd.xlane.f32.xlu0 %v545_v9  ;;  %633 = vadd.xlane.f32.xlu1 %v619_v11 }
 0x11e   :  { %635 = vadd.xlane.f32.xlu0 %v620_v12 }
 0x18b   :  { %v589_v13 = vpop.xlane.xlu0 %588 }
 0x18c   :  { %605 = vst.msk [vmem:[%s1162_s4] sm:$0xff] %vm604_vm0, %v589_v13 }
 0x18d   :  { %v591_v14 = vpop.xlane.xlu1 %590 }
 0x18e   :  { %606 = vst.msk [vmem:[%s1162_s4 + $0x8] sm:$0xff] %vm604_vm0, %v591_v14 }
 0x18f   :  { %v624_v15 = vpop.xlane.xlu0 %623 }
 0x190   :  { %638 = vst.msk [vmem:[%s1163_s5 + $0x8] sm:$0xff] %vm604_vm0, %v624_v15 }
 0x191   :  { %v622_v16 = vpop.xlane.xlu1 %621 }
 0x192   :  { %637 = vst.msk [vmem:[%s1163_s5] sm:$0xff] %vm604_vm0, %v622_v16 }
 0x193   :  { %v593_v17 = vpop.xlane.xlu0 %592 }
 0x194   :  { %607 = vst.msk [vmem:[%s1162_s4 + $0x10] sm:$0xff] %vm604_vm0, %v593_v17 }
 0x195   :  { %v626_v18 = vpop.xlane.xlu1 %625 }
 0x196   :  { %639 = vst.msk [vmem:[%s1163_s5 + $0x10] sm:$0xff] %vm604_vm0, %v626_v18 }
 0x197   :  { %v595_v19 = vpop.xlane.xlu0 %594 }
 0x198   :  { %608 = vst.msk [vmem:[%s1162_s4 + $0x18] sm:$0xff] %vm604_vm0, %v595_v19 }
 0x19b   :  { %v628_v20 = vpop.xlane.xlu0 %627  ;;  %v597_v21 = vpop.xlane.xlu1 %596 }
 0x19c   :  { %640 = vst.msk [vmem:[%s1163_s5 + $0x18] sm:$0xff] %vm604_vm0, %v628_v20  ;;  %609 = vst.msk [vmem:[%s1162_s4 + $0x20] sm:$0xff] %vm604_vm0, %v597_v21 }
 0x19f   :  { %v599_v22 = vpop.xlane.xlu0 %598  ;;  %v630_v23 = vpop.xlane.xlu1 %629 }
 0x1a0   :  { %610 = vst.msk [vmem:[%s1162_s4 + $0x28] sm:$0xff] %vm604_vm0, %v599_v22  ;;  %641 = vst.msk [vmem:[%s1163_s5 + $0x20] sm:$0xff] %vm604_vm0, %v630_v23 }
 0x1a3   :  { %v632_v24 = vpop.xlane.xlu0 %631  ;;  %v601_v25 = vpop.xlane.xlu1 %600 }
 0x1a4   :  { %642 = vst.msk [vmem:[%s1163_s5 + $0x28] sm:$0xff] %vm604_vm0, %v632_v24  ;;  %611 = vst.msk [vmem:[%s1162_s4 + $0x30] sm:$0xff] %vm604_vm0, %v601_v25 }
 0x1a7   :  { %v603_v26 = vpop.xlane.xlu0 %602  ;;  %v634_v27 = vpop.xlane.xlu1 %633 }
 0x1a8   :  { %612 = vst.msk [vmem:[%s1162_s4 + $0x38] sm:$0xff] %vm604_vm0, %v603_v26  ;;  %643 = vst.msk [vmem:[%s1163_s5 + $0x30] sm:$0xff] %vm604_vm0, %v634_v27 }
 0x1ab   :  { %v636_v28 = vpop.xlane.xlu0 %635 }
 0x1ac   :  { %644 = vst.msk [vmem:[%s1163_s5 + $0x38] sm:$0xff] %vm604_vm0, %v636_v28 }

// kernel: discriminator_forward.7
= control target key start
LH: loop header
LB: loop body
LE: loop exit
PB: predicated region body
PF: predicated region fallthrough
CT: control target
= control target key end

     0   :  { %v2120_v1 = vmov 0   ;;  %vm1479_vm0 = vcmask 261120   ;;  %vm1462_vm1 = vcmask 257024   ;;  %vm1528_vm2 = vcmask 7168   ;;  %s2855_s0 = inlined_call_operand.vmem [shape: bf16[1024,32], index: 0, kind: input, shape index: {}]   ;;  %s2856_s1 = inlined_call_operand.vmem [shape: bf16[128,1024], index: 1, kind: input, shape index: {}]   ;;  %s2857_s2 = inlined_call_operand.vmem [shape: f32[128,1], index: 2, kind: input, shape index: {}]   ;;  %s2858_s3 = inlined_call_operand.vmem [shape: bf16[128,32], index: 3, kind: output, shape index: {0}]   ;;  %s2859_s4 = inlined_call_operand.vmem [shape: f32[1,128,1], index: 4, kind: output, shape index: {1}]   ;;  %s2860_s5 = inlined_call_operand.vmem [shape: f32[1,128,1], index: 5, kind: output, shape index: {2}]  }
   0x1   :  { %v2056_v0 = vld [vmem:[%s2855_s0 + $0x40] sm:$0xff]   ;;  %2054 = vset.pattern.permute.xlu0 %v2120_v1  ;;  %2055 = vset.pattern.permute.xlu1 %v2120_v1  ;;  %v2060_v5 = vld [vmem:[%s2855_s0 + $0x48] sm:$0xff]   ;;  %v2064_v9 = vld [vmem:[%s2855_s0 + $0x50] sm:$0xff]  }
   0x2   :  { %v2057_v2 = vld [vmem:[%s2855_s0 + $0xc0] sm:$0xff]   ;;  %1797 = vmatprep.subr.bf16.mxu0 %v2056_v0  ;;  %v2061_v6 = vld [vmem:[%s2855_s0 + $0xc8] sm:$0xff]   ;;  %v2065_v10 = vld [vmem:[%s2855_s0 + $0xd0] sm:$0xff]  }
   0x3   :  { %v2058_v3 = vld [vmem:[%s2855_s0] sm:$0xff]   ;;  %1861 = vmatprep.subr.bf16.mxu1 %v2057_v2  ;;  %v2062_v7 = vld [vmem:[%s2855_s0 + $0x8] sm:$0xff]   ;;  %v2066_v11 = vld [vmem:[%s2855_s0 + $0x10] sm:$0xff]  }
   0x4   :  { %v2059_v4 = vld [vmem:[%s2855_s0 + $0x80] sm:$0xff]   ;;  %1798 = vmatpush3.bf16.msra.mxu0 %v2058_v3  ;;  %v2063_v8 = vld [vmem:[%s2855_s0 + $0x88] sm:$0xff]   ;;  %v2067_v12 = vld [vmem:[%s2855_s0 + $0x90] sm:$0xff]  }
   0x5   :  { %1862 = vmatpush3.bf16.msra.mxu1 %v2059_v4  ;;  %1799 = vmatprep.subr.bf16.mxu0 %v2060_v5  ;;  %v2068_v13 = vld [vmem:[%s2855_s0 + $0x58] sm:$0xff]   ;;  %v2072_v17 = vld [vmem:[%s2855_s0 + $0x60] sm:$0xff]   ;;  %v2076_v21 = vld [vmem:[%s2855_s0 + $0x68] sm:$0xff]  }
   0x6   :  { %1863 = vmatprep.subr.bf16.mxu1 %v2061_v6  ;;  %v2069_v14 = vld [vmem:[%s2855_s0 + $0xd8] sm:$0xff]   ;;  %v2073_v18 = vld [vmem:[%s2855_s0 + $0xe0] sm:$0xff]   ;;  %v2077_v22 = vld [vmem:[%s2855_s0 + $0xe8] sm:$0xff]  }
   0x7   :  { %v2070_v15 = vld [vmem:[%s2855_s0 + $0x18] sm:$0xff]   ;;  %v2074_v19 = vld [vmem:[%s2855_s0 + $0x20] sm:$0xff]   ;;  %v2078_v23 = vld [vmem:[%s2855_s0 + $0x28] sm:$0xff]  }
   0x8   :  { %1800 = vmatpush3.bf16.msra.mxu0 %v2062_v7  ;;  %v2071_v16 = vld [vmem:[%s2855_s0 + $0x98] sm:$0xff]   ;;  %v2075_v20 = vld [vmem:[%s2855_s0 + $0xa0] sm:$0xff]   ;;  %v2079_v24 = vld [vmem:[%s2855_s0 + $0xa8] sm:$0xff]  }
   0x9   :  { %1864 = vmatpush3.bf16.msra.mxu1 %v2063_v8  ;;  %1801 = vmatprep.subr.bf16.mxu0 %v2064_v9  ;;  %v2080_v25 = vld [vmem:[%s2855_s0 + $0x70] sm:$0xff]   ;;  %v2084_v29 = vld [vmem:[%s2855_s0 + $0x78] sm:$0xff]   ;;  %v18_v33 = vld [vmem:[%s2856_s1] sm:$0xff] }
   0xa   :  { %1865 = vmatprep.subr.bf16.mxu1 %v2065_v10  ;;  %v2081_v26 = vld [vmem:[%s2855_s0 + $0xf0] sm:$0xff]   ;;  %v2085_v30 = vld [vmem:[%s2855_s0 + $0xf8] sm:$0xff]   ;;  %v22_v34 = vld [vmem:[%s2856_s1 + $0x20] sm:$0xff] }
   0xb   :  { %v2082_v27 = vld [vmem:[%s2855_s0 + $0x30] sm:$0xff]   ;;  %v2086_v31 = vld [vmem:[%s2855_s0 + $0x38] sm:$0xff]   ;;  %v19_v35 = vld [vmem:[%s2856_s1 + $0x8] sm:$0xff]  ;;  %v1637_v36 = vcombine.low %v18_v33, %v22_v34  ;;  %v1638_v37 = vcombine.high %v18_v33, %v22_v34 }
   0xc   :  { %1802 = vmatpush3.bf16.msra.mxu0 %v2066_v11  ;;  %v2083_v28 = vld [vmem:[%s2855_s0 + $0xb0] sm:$0xff]   ;;  %v2087_v32 = vld [vmem:[%s2855_s0 + $0xb8] sm:$0xff]   ;;  %v23_v38 = vld [vmem:[%s2856_s1 + $0x28] sm:$0xff] }
   0xd   :  { %1866 = vmatpush3.bf16.msra.mxu1 %v2067_v12  ;;  %1803 = vmatprep.subr.bf16.mxu0 %v2068_v13  ;;  %v1639_v39 = vcombine.low %v19_v35, %v23_v38  ;;  %v1640_v40 = vcombine.high %v19_v35, %v23_v38  ;;  %v2088_v41 = vld [vmem:[%s2855_s0 + $0x140] sm:$0xff]   ;;  %v27_v48 = vld [vmem:[%s2856_s1 + $0x48] sm:$0xff]  ;;  %v2096_v63 = vld [vmem:[%s2855_s0 + $0x150] sm:$0xff]  }
   0xe   :  { %1867 = vmatprep.subr.bf16.mxu1 %v2069_v14  ;;  %1042 = vmatprep.mubr.bf16.mxu0 %v1638_v37  ;;  %v2089_v42 = vld [vmem:[%s2855_s0 + $0x100] sm:$0xff]   ;;  %v31_v49 = vld [vmem:[%s2856_s1 + $0x68] sm:$0xff]  ;;  %v2097_v0 = vld [vmem:[%s2855_s0 + $0x110] sm:$0xff]  }
   0xf   :  { %1139 = vmatprep.mubr.bf16.mxu1 %v1640_v40  ;;  %v2090_v43 = vld [vmem:[%s2855_s0 + $0x1c0] sm:$0xff]   ;;  %v1648_v50 = vcombine.high %v27_v48, %v31_v49  ;;  %v2092_v51 = vld [vmem:[%s2855_s0 + $0x148] sm:$0xff]   ;;  %v1647_v54 = vcombine.low %v27_v48, %v31_v49  ;;  %v2098_v1 = vld [vmem:[%s2855_s0 + $0x1d0] sm:$0xff]  }
  0x10   :  { %1804 = vmatpush3.bf16.msra.mxu0 %v2070_v15  ;;  %v2091_v44 = vld [vmem:[%s2855_s0 + $0x180] sm:$0xff]   ;;  %v2093_v53 = vld [vmem:[%s2855_s0 + $0x108] sm:$0xff]   ;;  %v2099_v2 = vld [vmem:[%s2855_s0 + $0x190] sm:$0xff]  }
  0x11   :  { %1868 = vmatpush3.bf16.msra.mxu1 %v2071_v16  ;;  %1805 = vmatprep.subr.bf16.mxu0 %v2072_v17  ;;  %v26_v45 = vld [vmem:[%s2856_s1 + $0x40] sm:$0xff]  ;;  %v2094_v55 = vld [vmem:[%s2855_s0 + $0x1c8] sm:$0xff]   ;;  %v2100_v11 = vld [vmem:[%s2855_s0 + $0x158] sm:$0xff]  }
  0x12   :  { %1869 = vmatprep.subr.bf16.mxu1 %v2073_v18  ;;  %v30_v46 = vld [vmem:[%s2856_s1 + $0x60] sm:$0xff]  ;;  %v2095_v56 = vld [vmem:[%s2855_s0 + $0x188] sm:$0xff]   ;;  %v2101_v12 = vld [vmem:[%s2855_s0 + $0x118] sm:$0xff]  }
  0x13   :  { %v1646_v47 = vcombine.high %v26_v45, %v30_v46  ;;  %v1645_v52 = vcombine.low %v26_v45, %v30_v46  ;;  %v34_v57 = vld [vmem:[%s2856_s1 + $0x80] sm:$0xff]  ;;  %v35_v59 = vld [vmem:[%s2856_s1 + $0x88] sm:$0xff]  ;;  %v2102_v13 = vld [vmem:[%s2855_s0 + $0x1d8] sm:$0xff]  }
  0x14   :  { %1806 = vmatpush3.bf16.msra.mxu0 %v2074_v19  ;;  %v38_v58 = vld [vmem:[%s2856_s1 + $0xa0] sm:$0xff]  ;;  %v39_v60 = vld [vmem:[%s2856_s1 + $0xa8] sm:$0xff]  ;;  %v2103_v14 = vld [vmem:[%s2855_s0 + $0x198] sm:$0xff]  }
  0x15   :  { %1870 = vmatpush3.bf16.msra.mxu1 %v2075_v20  ;;  %1807 = vmatprep.subr.bf16.mxu0 %v2076_v21  ;;  %v1654_v61 = vcombine.high %v34_v57, %v38_v58  ;;  %v1656_v62 = vcombine.high %v35_v59, %v39_v60  ;;  %v1653_v3 = vcombine.low %v34_v57, %v38_v58  ;;  %v42_v4 = vld [vmem:[%s2856_s1 + $0xc0] sm:$0xff]  ;;  %v43_v6 = vld [vmem:[%s2856_s1 + $0xc8] sm:$0xff]  ;;  %v2113_v40 = vld [vmem:[%s2855_s0 + $0x130] sm:$0xff]  }
  0x16   :  { %1871 = vmatprep.subr.bf16.mxu1 %v2077_v22  ;;  %v46_v5 = vld [vmem:[%s2856_s1 + $0xe0] sm:$0xff]  ;;  %v1655_v7 = vcombine.low %v35_v59, %v39_v60  ;;  %v47_v9 = vld [vmem:[%s2856_s1 + $0xe8] sm:$0xff]  ;;  %v2117_v49 = vld [vmem:[%s2855_s0 + $0x138] sm:$0xff]  }
  0x17   :  { %v1662_v8 = vcombine.high %v42_v4, %v46_v5  ;;  %v1664_v10 = vcombine.high %v43_v6, %v47_v9  ;;  %v50_v15 = vld [vmem:[%s2856_s1 + $0x100] sm:$0xff]  ;;  %v51_v17 = vld [vmem:[%s2856_s1 + $0x108] sm:$0xff]  ;;  %v1661_v20 = vcombine.low %v42_v4, %v46_v5  ;;  %v1663_v22 = vcombine.low %v43_v6, %v47_v9  ;;  %v20_v4 = vld [vmem:[%s2856_s1 + $0x10] sm:$0xff] }
  0x18   :  { %1808 = vmatpush3.bf16.msra.mxu0 %v2078_v23  ;;  %v54_v16 = vld [vmem:[%s2856_s1 + $0x120] sm:$0xff]  ;;  %v55_v18 = vld [vmem:[%s2856_s1 + $0x128] sm:$0xff]  ;;  %v24_v5 = vld [vmem:[%s2856_s1 + $0x30] sm:$0xff] }
  0x19   :  { %1872 = vmatpush3.bf16.msra.mxu1 %v2079_v24  ;;  %1809 = vmatprep.subr.bf16.mxu0 %v2080_v25  ;;  %v2104_v19 = vld [vmem:[%s2855_s0 + $0x160] sm:$0xff]   ;;  %v1670_v23 = vcombine.high %v50_v15, %v54_v16  ;;  %v1672_v25 = vcombine.high %v51_v17, %v55_v18  ;;  %v2110_v33 = vld [vmem:[%s2855_s0 + $0x1e8] sm:$0xff]   ;;  %v1669_v35 = vcombine.low %v50_v15, %v54_v16  ;;  %v21_v6 = vld [vmem:[%s2856_s1 + $0x18] sm:$0xff] }
  0x1a   :  { %1873 = vmatprep.subr.bf16.mxu1 %v2081_v26  ;;  %v2105_v21 = vld [vmem:[%s2855_s0 + $0x120] sm:$0xff]   ;;  %v2111_v34 = vld [vmem:[%s2855_s0 + $0x1a8] sm:$0xff]   ;;  %v28_v16 = vld [vmem:[%s2856_s1 + $0x50] sm:$0xff] }
  0x1b   :  { %v2106_v24 = vld [vmem:[%s2855_s0 + $0x1e0] sm:$0xff]   ;;  %v67_v45 = vld [vmem:[%s2856_s1 + $0x188] sm:$0xff] }
  0x1c   :  { %1810 = vmatpush3.bf16.msra.mxu0 %v2082_v27  ;;  %v2107_v26 = vld [vmem:[%s2855_s0 + $0x1a0] sm:$0xff]   ;;  %v71_v46 = vld [vmem:[%s2856_s1 + $0x1a8] sm:$0xff] }
  0x1d   :  { %1874 = vmatpush3.bf16.msra.mxu1 %v2083_v28  ;;  %1811 = vmatprep.subr.bf16.mxu0 %v2084_v29  ;;  %v58_v27 = vld [vmem:[%s2856_s1 + $0x140] sm:$0xff]  ;;  %v2108_v29 = vld [vmem:[%s2855_s0 + $0x168] sm:$0xff]  }
  0x1e   :  { %1875 = vmatprep.subr.bf16.mxu1 %v2085_v30  ;;  %v62_v28 = vld [vmem:[%s2856_s1 + $0x160] sm:$0xff]  ;;  %v59_v30 = vld [vmem:[%s2856_s1 + $0x148] sm:$0xff] }
  0x1f   :  { %v1678_v37 = vcombine.high %v58_v27, %v62_v28  ;;  %v1677_v48 = vcombine.low %v58_v27, %v62_v28  ;;  %v210_v57 = vld [vmem:[%s2857_s2] sm:$0xff]  ;;  %v75_v58 = vld [vmem:[%s2856_s1 + $0x1c8] sm:$0xff]  ;;  %v36_v28 = vld [vmem:[%s2856_s1 + $0x90] sm:$0xff] }
  0x20   :  { %1812 = vmatpush3.bf16.msra.mxu0 %v2086_v31  ;;  %v63_v31 = vld [vmem:[%s2856_s1 + $0x168] sm:$0xff]  ;;  %228 = vperm.xlu0 %2054, %v210_v57   ;;  %v218_v15 = vld [vmem:[%s2857_s2 + $0x40] sm:$0xff]  ;;  %v61_v57 = vld [vmem:[%s2856_s1 + $0x158] sm:$0xff] }
  0x21   :  { %1876 = vmatpush3.bf16.msra.mxu1 %v2087_v32  ;;  %1925 = vmatprep.subr.bf16.mxu0 %v2088_v41  ;;  %v2109_v32 = vld [vmem:[%s2855_s0 + $0x128] sm:$0xff]   ;;  %v1680_v38 = vcombine.high %v59_v30, %v63_v31  ;;  %v2114_v41 = vld [vmem:[%s2855_s0 + $0x1f0] sm:$0xff]   ;;  %v222_v27 = vld [vmem:[%s2857_s2 + $0x60] sm:$0xff] }
  0x22   :  { %1989 = vmatprep.subr.bf16.mxu1 %v2090_v43  ;;  %v70_v43 = vld [vmem:[%s2856_s1 + $0x1a0] sm:$0xff]  ;;  %v79_v59 = vld [vmem:[%s2856_s1 + $0x1e8] sm:$0xff] }
  0x23   :  { %1043 = vmatmul.mubr.bf16.vlgmr.msra.gmra.mrb[0].mxu0 %v1637_v36  ;;  %v1671_v36 = vcombine.low %v51_v17, %v55_v18  ;;  %v32_v17 = vld [vmem:[%s2856_s1 + $0x70] sm:$0xff]  ;;  %v29_v18 = vld [vmem:[%s2856_s1 + $0x58] sm:$0xff] }
  0x24   :  { %1140 = vmatmul.mubr.bf16.vlgmr.msra.gmra.mrb[0].mxu1 %v1639_v39  ;;  %1926 = vmatpush3.bf16.msra.mxu0 %v2089_v42  ;;  %v2112_v39 = vld [vmem:[%s2855_s0 + $0x170] sm:$0xff]   ;;  %v66_v42 = vld [vmem:[%s2856_s1 + $0x180] sm:$0xff] }
  0x25   :  { %1990 = vmatpush3.bf16.msra.mxu1 %v2091_v44  ;;  %1050 = vmatprep.mubr.bf16.mxu0 %v1646_v47  ;;  %v2115_v44 = vld [vmem:[%s2855_s0 + $0x1b0] sm:$0xff]   ;;  %v2116_v47 = vld [vmem:[%s2855_s0 + $0x178] sm:$0xff]   ;;  %v1685_v60 = vcombine.low %v66_v42, %v70_v43 }
  0x26   :  { %1147 = vmatprep.mubr.bf16.mxu1 %v1648_v50  ;;  %1927 = vmatprep.subr.bf16.mxu0 %v2092_v51  ;;  %v1679_v50 = vcombine.low %v59_v30, %v63_v31  ;;  %v1686_v51 = vcombine.high %v66_v42, %v70_v43  ;;  %v37_v30 = vld [vmem:[%s2856_s1 + $0x98] sm:$0xff] }
  0x27   :  { %1991 = vmatprep.subr.bf16.mxu1 %v2094_v55  ;;  %v74_v55 = vld [vmem:[%s2856_s1 + $0x1c0] sm:$0xff]  ;;  %v41_v31 = vld [vmem:[%s2856_s1 + $0xb8] sm:$0xff] }
  0x28   :  { %1928 = vmatpush3.bf16.msra.mxu0 %v2093_v53  ;;  %v1688_v53 = vcombine.high %v67_v45, %v71_v46  ;;  %v49_v42 = vld [vmem:[%s2856_s1 + $0xf8] sm:$0xff] }
  0x29   :  { %1992 = vmatpush3.bf16.msra.mxu1 %v2095_v56  ;;  %1929 = vmatprep.subr.bf16.mxu0 %v2096_v63  ;;  %v78_v56 = vld [vmem:[%s2856_s1 + $0x1e0] sm:$0xff]  ;;  %v1687_v63 = vcombine.low %v67_v45, %v71_v46 }
  0x2a   :  { %1993 = vmatprep.subr.bf16.mxu1 %v2098_v1  ;;  %v1696_v1 = vcombine.high %v75_v58, %v79_v59  ;;  %v1693_v9 = vcombine.low %v74_v55, %v78_v56 }
  0x2b   :  { %1051 = vmatmul.mubr.bf16.gmra.mrb[4].mxu0 %v1645_v52  ;;  %v2118_v52 = vld [vmem:[%s2855_s0 + $0x1f8] sm:$0xff]  }
  0x2c   :  { %1148 = vmatmul.mubr.bf16.gmra.mrb[4].mxu1 %v1647_v54  ;;  %1058 = vmatprep.mubr.bf16.mxu0 %v1654_v61  ;;  %v2119_v54 = vld [vmem:[%s2855_s0 + $0x1b8] sm:$0xff]   ;;  %v211_v61 = vld [vmem:[%s2857_s2 + $0x8] sm:$0xff] }
  0x2d   :  { %1155 = vmatprep.mubr.bf16.mxu1 %v1656_v62  ;;  %1930 = vmatpush3.bf16.msra.mxu0 %v2097_v0  ;;  %v212_v62 = vld [vmem:[%s2857_s2 + $0x10] sm:$0xff]  ;;  %v1694_v0 = vcombine.high %v74_v55, %v78_v56 }
  0x2e   :  { %1994 = vmatpush3.bf16.msra.mxu1 %v2099_v2  ;;  %1931 = vmatprep.subr.bf16.mxu0 %v2100_v11  ;;  %v213_v2 = vld [vmem:[%s2857_s2 + $0x18] sm:$0xff]  ;;  %v1695_v11 = vcombine.low %v75_v58, %v79_v59  ;;  %v60_v55 = vld [vmem:[%s2856_s1 + $0x150] sm:$0xff] }
  0x2f   :  { %1995 = vmatprep.subr.bf16.mxu1 %v2102_v13  ;;  %238 = vperm.xlu1 %2055, %v212_v62   ;;  %v64_v56 = vld [vmem:[%s2856_s1 + $0x170] sm:$0xff]  ;;  %v65_v58 = vld [vmem:[%s2856_s1 + $0x178] sm:$0xff] }
  0x30   :  { %233 = vperm.xlu0 %2054, %v211_v61   ;;  %v1682_v61 = vcombine.high %v60_v55, %v64_v56  ;;  %v1684_v62 = vcombine.high %v61_v57, %v65_v58 }
  0x31   :  { %1932 = vmatpush3.bf16.msra.mxu0 %v2101_v12  ;;  %v1642_v12 = vcombine.high %v20_v4, %v24_v5 }
  0x32   :  { %1996 = vmatpush3.bf16.msra.mxu1 %v2103_v14  ;;  %1933 = vmatprep.subr.bf16.mxu0 %v2104_v19  ;;  %v217_v14 = vld [vmem:[%s2857_s2 + $0x38] sm:$0xff] }
  0x33   :  { %1059 = vmatmul.mubr.bf16.gmra.mrb[8].mxu0 %v1653_v3  ;;  %1997 = vmatprep.subr.bf16.mxu1 %v2106_v24  ;;  %v214_v3 = vld [vmem:[%s2857_s2 + $0x20] sm:$0xff]  ;;  %v33_v19 = vld [vmem:[%s2856_s1 + $0x78] sm:$0xff]  ;;  %v1650_v24 = vcombine.high %v28_v16, %v32_v17 }
  0x34   :  { %1156 = vmatmul.mubr.bf16.gmra.mrb[8].mxu1 %v1655_v7  ;;  %1066 = vmatprep.mubr.bf16.mxu0 %v1662_v8  ;;  %v25_v7 = vld [vmem:[%s2856_s1 + $0x38] sm:$0xff]  ;;  %v215_v8 = vld [vmem:[%s2857_s2 + $0x28] sm:$0xff] }
  0x35   :  { %1163 = vmatprep.mubr.bf16.mxu1 %v1664_v10  ;;  %1934 = vmatpush3.bf16.msra.mxu0 %v2105_v21  ;;  %v216_v10 = vld [vmem:[%s2857_s2 + $0x30] sm:$0xff]  ;;  %v1644_v13 = vcombine.high %v21_v6, %v25_v7  ;;  %v1641_v21 = vcombine.low %v20_v4, %v24_v5  ;;  %v1683_v4 = vcombine.low %v61_v57, %v65_v58 }
  0x36   :  { %1998 = vmatpush3.bf16.msra.mxu1 %v2107_v26  ;;  %1935 = vmatprep.subr.bf16.mxu0 %v2108_v29  ;;  %v221_v26 = vld [vmem:[%s2857_s2 + $0x58] sm:$0xff]  ;;  %v40_v29 = vld [vmem:[%s2856_s1 + $0xb0] sm:$0xff] }
  0x37   :  { %1999 = vmatprep.subr.bf16.mxu1 %v2110_v33  ;;  %243 = vperm.xlu1 %2055, %v213_v2   ;;  %v1649_v33 = vcombine.low %v28_v16, %v32_v17  ;;  %v1657_v43 = vcombine.low %v36_v28, %v40_v29  ;;  %v73_v2 = vld [vmem:[%s2856_s1 + $0x1b8] sm:$0xff] }
  0x38   :  { %248 = vperm.xlu0 %2054, %v214_v3   ;;  %v1681_v3 = vcombine.low %v60_v55, %v64_v56 }
  0x39   :  { %1936 = vmatpush3.bf16.msra.mxu0 %v2109_v32  ;;  %v223_v32 = vld [vmem:[%s2857_s2 + $0x68] sm:$0xff] }
  0x3a   :  { %2000 = vmatpush3.bf16.msra.mxu1 %v2111_v34  ;;  %1937 = vmatprep.subr.bf16.mxu0 %v2112_v39  ;;  %v224_v34 = vld [vmem:[%s2857_s2 + $0x70] sm:$0xff] }
  0x3b   :  { %1067 = vmatmul.mubr.bf16.gmra.mrb[12].mxu0 %v1661_v20  ;;  %2001 = vmatprep.subr.bf16.mxu1 %v2114_v41  ;;  %v219_v20 = vld [vmem:[%s2857_s2 + $0x48] sm:$0xff]  ;;  %v44_v39 = vld [vmem:[%s2856_s1 + $0xd0] sm:$0xff]  ;;  %v45_v41 = vld [vmem:[%s2856_s1 + $0xd8] sm:$0xff] }
  0x3c   :  { %1164 = vmatmul.mubr.bf16.gmra.mrb[12].mxu1 %v1663_v22  ;;  %1074 = vmatprep.mubr.bf16.mxu0 %v1670_v23  ;;  %v220_v22 = vld [vmem:[%s2857_s2 + $0x50] sm:$0xff]  ;;  %v1643_v23 = vcombine.low %v21_v6, %v25_v7  ;;  %v1668_v46 = vcombine.high %v45_v41, %v49_v42 }
  0x3d   :  { %1171 = vmatprep.mubr.bf16.mxu1 %v1672_v25  ;;  %1938 = vmatpush3.bf16.msra.mxu0 %v2113_v40  ;;  %v1652_v25 = vcombine.high %v29_v18, %v33_v19  ;;  %v48_v40 = vld [vmem:[%s2856_s1 + $0xf0] sm:$0xff] }
  0x3e   :  { %2002 = vmatpush3.bf16.msra.mxu1 %v2115_v44  ;;  %1939 = vmatprep.subr.bf16.mxu0 %v2116_v47  ;;  %v1659_v44 = vcombine.low %v37_v30, %v41_v31  ;;  %v1666_v45 = vcombine.high %v44_v39, %v48_v40  ;;  %v52_v47 = vld [vmem:[%s2856_s1 + $0x110] sm:$0xff] }
  0x3f   :  { %2003 = vmatprep.subr.bf16.mxu1 %v2118_v52  ;;  %253 = vperm.xlu1 %2055, %v215_v8   ;;  %v1667_v52 = vcombine.low %v45_v41, %v49_v42  ;;  %v76_v7 = vld [vmem:[%s2856_s1 + $0x1d0] sm:$0xff] }
  0x40   :  { %258 = vperm.xlu0 %2054, %v216_v10   ;;  %v80_v8 = vld [vmem:[%s2856_s1 + $0x1f0] sm:$0xff]  ;;  %v81_v10 = vld [vmem:[%s2856_s1 + $0x1f8] sm:$0xff] }
  0x41   :  { %1940 = vmatpush3.bf16.msra.mxu0 %v2117_v49  ;;  %v53_v49 = vld [vmem:[%s2856_s1 + $0x118] sm:$0xff] }
  0x42   :  { %2004 = vmatpush3.bf16.msra.mxu1 %v2119_v54 }
  0x43   :  { %1075 = vmatmul.mubr.bf16.gmra.mrb[16].mxu0 %v1669_v35  ;;  %263 = vperm.xlu1 %2055, %v217_v14   ;;  %v1651_v35 = vcombine.low %v29_v18, %v33_v19 }
  0x44   :  { %1172 = vmatmul.mubr.bf16.gmra.mrb[16].mxu1 %v1671_v36  ;;  %1082 = vmatprep.mubr.bf16.mxu0 %v1678_v37  ;;  %v1658_v36 = vcombine.high %v36_v28, %v40_v29  ;;  %v1660_v37 = vcombine.high %v37_v30, %v41_v31 }
  0x45   :  { %1179 = vmatprep.mubr.bf16.mxu1 %v1680_v38  ;;  %268 = vperm.xlu0 %2054, %v218_v15   ;;  %v225_v38 = vld [vmem:[%s2857_s2 + $0x78] sm:$0xff]  ;;  %v1697_v15 = vcombine.low %v76_v7, %v80_v8 }
  0x47   :  { %273 = vperm.xlu1 %2055, %v219_v20  }
  0x49   :  { %278 = vperm.xlu0 %2054, %v220_v22  }
  0x4b   :  { %1083 = vmatmul.mubr.bf16.gmra.mrb[20].mxu0 %v1677_v48  ;;  %283 = vperm.xlu1 %2055, %v221_v26   ;;  %v56_v48 = vld [vmem:[%s2856_s1 + $0x130] sm:$0xff] }
  0x4c   :  { %1180 = vmatmul.mubr.bf16.gmra.mrb[20].mxu1 %v1679_v50  ;;  %1090 = vmatprep.mubr.bf16.mxu0 %v1686_v51  ;;  %v57_v50 = vld [vmem:[%s2856_s1 + $0x138] sm:$0xff]  ;;  %v1665_v51 = vcombine.low %v44_v39, %v48_v40  ;;  %v1673_v59 = vcombine.low %v52_v47, %v56_v48 }
  0x4d   :  { %1187 = vmatprep.mubr.bf16.mxu1 %v1688_v53  ;;  %288 = vperm.xlu0 %2054, %v222_v27   ;;  %v1674_v53 = vcombine.high %v52_v47, %v56_v48  ;;  %v1676_v54 = vcombine.high %v53_v49, %v57_v50 }
  0x4f   :  { %293 = vperm.xlu1 %2055, %v223_v32  }
  0x51   :  { %298 = vperm.xlu0 %2054, %v224_v34  }
  0x53   :  { %1091 = vmatmul.mubr.bf16.gmra.mrb[24].mxu0 %v1685_v60  ;;  %303 = vperm.xlu1 %2055, %v225_v38   ;;  %v1675_v60 = vcombine.low %v53_v49, %v57_v50 }
  0x54   :  { %1188 = vmatmul.mubr.bf16.gmra.mrb[24].mxu1 %v1687_v63  ;;  %1098 = vmatprep.mubr.bf16.mxu0 %v1694_v0  ;;  %v68_v63 = vld [vmem:[%s2856_s1 + $0x190] sm:$0xff] }
  0x55   :  { %1195 = vmatprep.mubr.bf16.mxu1 %v1696_v1  ;;  %v72_v0 = vld [vmem:[%s2856_s1 + $0x1b0] sm:$0xff]  ;;  %v69_v1 = vld [vmem:[%s2856_s1 + $0x198] sm:$0xff] }
  0x56   :  { %v1690_v5 = vcombine.high %v68_v63, %v72_v0  ;;  %v1692_v6 = vcombine.high %v69_v1, %v73_v2 }
  0x5b   :  { %1099 = vmatmul.mubr.bf16.gmra.mrb[28].mxu0 %v1693_v9  ;;  %v77_v9 = vld [vmem:[%s2856_s1 + $0x1d8] sm:$0xff] }
  0x5c   :  { %1196 = vmatmul.mubr.bf16.gmra.mrb[28].mxu1 %v1695_v11  ;;  %1236 = vmatprep.mubr.bf16.mxu0 %v1642_v12  ;;  %v1689_v11 = vcombine.low %v68_v63, %v72_v0  ;;  %v1691_v12 = vcombine.low %v69_v1, %v73_v2  ;;  %v1700_v14 = vcombine.high %v77_v9, %v81_v10 }
  0x5d   :  { %1333 = vmatprep.mubr.bf16.mxu1 %v1644_v13  ;;  %v1698_v13 = vcombine.high %v76_v7, %v80_v8  ;;  %v1699_v16 = vcombine.low %v77_v9, %v81_v10 }
  0x63   :  { %1237 = vmatmul.mubr.bf16.vlgmr.msra.gmra.mrb[32].mxu0 %v1641_v21 }
  0x64   :  { %1334 = vmatmul.mubr.bf16.vlgmr.msra.gmra.mrb[32].mxu1 %v1643_v23  ;;  %1244 = vmatprep.mubr.bf16.mxu0 %v1650_v24 }
  0x65   :  { %1341 = vmatprep.mubr.bf16.mxu1 %v1652_v25 }
  0x6b   :  { %1245 = vmatmul.mubr.bf16.gmra.mrb[36].mxu0 %v1649_v33 }
  0x6c   :  { %1342 = vmatmul.mubr.bf16.gmra.mrb[36].mxu1 %v1651_v35  ;;  %1252 = vmatprep.mubr.bf16.mxu0 %v1658_v36 }
  0x6d   :  { %1349 = vmatprep.mubr.bf16.mxu1 %v1660_v37 }
  0x73   :  { %1253 = vmatmul.mubr.bf16.gmra.mrb[40].mxu0 %v1657_v43 }
  0x74   :  { %1350 = vmatmul.mubr.bf16.gmra.mrb[40].mxu1 %v1659_v44  ;;  %1260 = vmatprep.mubr.bf16.mxu0 %v1666_v45 }
  0x75   :  { %1357 = vmatprep.mubr.bf16.mxu1 %v1668_v46 }
  0x7b   :  { %1261 = vmatmul.mubr.bf16.gmra.mrb[44].mxu0 %v1665_v51 }
  0x7c   :  { %1358 = vmatmul.mubr.bf16.gmra.mrb[44].mxu1 %v1667_v52  ;;  %1268 = vmatprep.mubr.bf16.mxu0 %v1674_v53 }
  0x7d   :  { %1365 = vmatprep.mubr.bf16.mxu1 %v1676_v54 }
  0x83   :  { %1269 = vmatmul.mubr.bf16.gmra.mrb[48].mxu0 %v1673_v59 }
  0x84   :  { %1366 = vmatmul.mubr.bf16.gmra.mrb[48].mxu1 %v1675_v60  ;;  %1276 = vmatprep.mubr.bf16.mxu0 %v1682_v61 }
  0x85   :  { %1373 = vmatprep.mubr.bf16.mxu1 %v1684_v62 }
  0x8b   :  { %1277 = vmatmul.mubr.bf16.gmra.mrb[52].mxu0 %v1681_v3 }
  0x8c   :  { %1374 = vmatmul.mubr.bf16.gmra.mrb[52].mxu1 %v1683_v4  ;;  %1284 = vmatprep.mubr.bf16.mxu0 %v1690_v5 }
  0x8d   :  { %1381 = vmatprep.mubr.bf16.mxu1 %v1692_v6 }
  0x93   :  { %1285 = vmatmul.mubr.bf16.gmra.mrb[56].mxu0 %v1689_v11 }
  0x94   :  { %1382 = vmatmul.mubr.bf16.gmra.mrb[56].mxu1 %v1691_v12  ;;  %1292 = vmatprep.mubr.bf16.mxu0 %v1698_v13 }
  0x95   :  { %1389 = vmatprep.mubr.bf16.mxu1 %v1700_v14 }
  0x9b   :  { %1293 = vmatmul.mubr.bf16.gmra.mrb[60].mxu0 %v1697_v15 }
  0x9c   :  { %1390 = vmatmul.mubr.bf16.gmra.mrb[60].mxu1 %v1699_v16 }
  0x9f   :  { %v229_v17 = vpop.permute.xlu0 %228 }
  0xae   :  { %v239_v18 = vpop.permute.xlu1 %238 }
  0xaf   :  { %v234_v20 = vpop.permute.xlu0 %233 }
  0xb6   :  { %v244_v37 = vpop.permute.xlu1 %243 }
  0xb7   :  { %v249_v52 = vpop.permute.xlu0 %248 }
  0xbe   :  { %v254_v55 = vpop.permute.xlu1 %253 }
  0xbf   :  { %v259_v6 = vpop.permute.xlu0 %258 }
  0xc2   :  { %v264_v9 = vpop.permute.xlu1 %263 }
  0xf6   :  { %v1813_v19 = vpop.f32.mrb[0].mxu0 }
  0xf7   :  { %v1877_v21 = vpop.f32.mrb[0].mxu1  ;;  %v1814_v22 = vpop.f32.mrb[1].mxu0 }
  0xf8   :  { %v1815_v23 = vadd.f32 %v1814_v22, %v1813_v19  ;;  %v1878_v24 = vpop.f32.mrb[1].mxu1  ;;  %v1816_v25 = vpop.f32.mrb[2].mxu0 }
  0xf9   :  { %v1879_v26 = vadd.f32 %v1878_v24, %v1877_v21  ;;  %v1880_v27 = vpop.f32.mrb[2].mxu1  ;;  %v1817_v28 = vpop.f32.mrb[3].mxu0 }
  0xfa   :  { %v1045_v29 = vadd.f32 %v1815_v23, %v229_v17  ;;  %v1818_v30 = vadd.f32 %v1817_v28, %v1816_v25  ;;  %v1881_v31 = vpop.f32.mrb[3].mxu1  ;;  %v269_v24 = vpop.permute.xlu0 %268 }
  0xfb   :  { %v1882_v32 = vadd.f32 %v1881_v31, %v1880_v27  ;;  %v274_v27 = vpop.permute.xlu1 %273 }
  0xfc   :  { %v2583_v33 = vadd.f32 %v1879_v26, %v1045_v29  ;;  %v1048_v34 = vadd.f32 %v1818_v30, %v234_v20 }
  0xfe   :  { %v2585_v35 = vadd.f32 %v1882_v32, %v1048_v34  ;;  %v1819_v36 = vpop.f32.mrb[4].mxu0 }
  0xff   :  { %v1883_v38 = vpop.f32.mrb[4].mxu1  ;;  %v1820_v39 = vpop.f32.mrb[5].mxu0 }
 0x100   :  { %v1821_v40 = vadd.f32 %v1820_v39, %v1819_v36  ;;  %v1884_v41 = vpop.f32.mrb[5].mxu1  ;;  %v1822_v42 = vpop.f32.mrb[6].mxu0 }
 0x101   :  { %v1885_v43 = vadd.f32 %v1884_v41, %v1883_v38  ;;  %v1886_v44 = vpop.f32.mrb[6].mxu1  ;;  %v1823_v45 = vpop.f32.mrb[7].mxu0 }
 0x102   :  { %v1053_v46 = vadd.f32 %v1821_v40, %v239_v18  ;;  %v1824_v47 = vadd.f32 %v1823_v45, %v1822_v42  ;;  %v1887_v48 = vpop.f32.mrb[7].mxu1 }
 0x103   :  { %v1888_v49 = vadd.f32 %v1887_v48, %v1886_v44  ;;  %v279_v44 = vpop.permute.xlu0 %278 }
 0x104   :  { %v2587_v50 = vadd.f32 %v1885_v43, %v1053_v46  ;;  %v1056_v51 = vadd.f32 %v1824_v47, %v244_v37  ;;  %v284_v47 = vpop.permute.xlu1 %283 }
 0x106   :  { %v2589_v53 = vadd.f32 %v1888_v49, %v1056_v51  ;;  %v1825_v54 = vpop.f32.mrb[8].mxu0 }
 0x107   :  { %v1889_v56 = vpop.f32.mrb[8].mxu1  ;;  %v1826_v57 = vpop.f32.mrb[9].mxu0 }
 0x108   :  { %v1827_v58 = vadd.f32 %v1826_v57, %v1825_v54  ;;  %v1890_v59 = vpop.f32.mrb[9].mxu1  ;;  %v1828_v60 = vpop.f32.mrb[10].mxu0 }
 0x109   :  { %v1891_v61 = vadd.f32 %v1890_v59, %v1889_v56  ;;  %v1892_v62 = vpop.f32.mrb[10].mxu1  ;;  %v1829_v63 = vpop.f32.mrb[11].mxu0 }
 0x10a   :  { %v1061_v0 = vadd.f32 %v1827_v58, %v249_v52  ;;  %v1830_v1 = vadd.f32 %v1829_v63, %v1828_v60  ;;  %v1893_v2 = vpop.f32.mrb[11].mxu1 }
 0x10b   :  { %v1894_v3 = vadd.f32 %v1893_v2, %v1892_v62 }
 0x10c   :  { %v2591_v4 = vadd.f32 %v1891_v61, %v1061_v0  ;;  %v1064_v5 = vadd.f32 %v1830_v1, %v254_v55  ;;  %v289_v0 = vpop.permute.xlu0 %288 }
 0x10e   :  { %v2593_v7 = vadd.f32 %v1894_v3, %v1064_v5  ;;  %v1831_v8 = vpop.f32.mrb[12].mxu0  ;;  %v294_v3 = vpop.permute.xlu1 %293 }
 0x10f   :  { %v1895_v10 = vpop.f32.mrb[12].mxu1  ;;  %v1832_v11 = vpop.f32.mrb[13].mxu0 }
 0x110   :  { %v1833_v12 = vadd.f32 %v1832_v11, %v1831_v8  ;;  %v1896_v13 = vpop.f32.mrb[13].mxu1  ;;  %v1834_v14 = vpop.f32.mrb[14].mxu0 }
 0x111   :  { %v1897_v15 = vadd.f32 %v1896_v13, %v1895_v10  ;;  %v1898_v16 = vpop.f32.mrb[14].mxu1  ;;  %v1835_v17 = vpop.f32.mrb[15].mxu0 }
 0x112   :  { %v1069_v18 = vadd.f32 %v1833_v12, %v259_v6  ;;  %v1836_v19 = vadd.f32 %v1835_v17, %v1834_v14  ;;  %v1899_v20 = vpop.f32.mrb[15].mxu1 }
 0x113   :  { %v1900_v21 = vadd.f32 %v1899_v20, %v1898_v16  ;;  %v299_v20 = vpop.permute.xlu0 %298 }
 0x114   :  { %v2595_v22 = vadd.f32 %v1897_v15, %v1069_v18  ;;  %v1072_v23 = vadd.f32 %v1836_v19, %v264_v9 }
 0x116   :  { %v2597_v25 = vadd.f32 %v1900_v21, %v1072_v23  ;;  %v1837_v26 = vpop.f32.mrb[16].mxu0 }
 0x117   :  { %v1901_v28 = vpop.f32.mrb[16].mxu1  ;;  %v1838_v29 = vpop.f32.mrb[17].mxu0 }
 0x118   :  { %v1839_v30 = vadd.f32 %v1838_v29, %v1837_v26  ;;  %v1902_v31 = vpop.f32.mrb[17].mxu1  ;;  %v1840_v32 = vpop.f32.mrb[18].mxu0 }
 0x119   :  { %v1903_v34 = vadd.f32 %v1902_v31, %v1901_v28  ;;  %v1904_v36 = vpop.f32.mrb[18].mxu1  ;;  %v1841_v37 = vpop.f32.mrb[19].mxu0 }
 0x11a   :  { %v1077_v38 = vadd.f32 %v1839_v30, %v269_v24  ;;  %v1842_v39 = vadd.f32 %v1841_v37, %v1840_v32  ;;  %v1905_v40 = vpop.f32.mrb[19].mxu1  ;;  %v304_v24 = vpop.permute.xlu1 %303 }
 0x11b   :  { %v1906_v41 = vadd.f32 %v1905_v40, %v1904_v36 }
 0x11c   :  { %v2599_v42 = vadd.f32 %v1903_v34, %v1077_v38  ;;  %v1080_v43 = vadd.f32 %v1842_v39, %v274_v27 }
 0x11e   :  { %v2601_v45 = vadd.f32 %v1906_v41, %v1080_v43  ;;  %v1843_v46 = vpop.f32.mrb[20].mxu0 }
 0x11f   :  { %v1907_v48 = vpop.f32.mrb[20].mxu1  ;;  %v1844_v49 = vpop.f32.mrb[21].mxu0 }
 0x120   :  { %v1845_v51 = vadd.f32 %v1844_v49, %v1843_v46  ;;  %v1908_v52 = vpop.f32.mrb[21].mxu1  ;;  %v1846_v54 = vpop.f32.mrb[22].mxu0 }
 0x121   :  { %v1909_v55 = vadd.f32 %v1908_v52, %v1907_v48  ;;  %v1910_v56 = vpop.f32.mrb[22].mxu1  ;;  %v1847_v57 = vpop.f32.mrb[23].mxu0 }
 0x122   :  { %v1085_v58 = vadd.f32 %v1845_v51, %v279_v44  ;;  %v1848_v59 = vadd.f32 %v1847_v57, %v1846_v54  ;;  %v1911_v60 = vpop.f32.mrb[23].mxu1 }
 0x123   :  { %v1912_v61 = vadd.f32 %v1911_v60, %v1910_v56 }
 0x124   :  { %v2603_v62 = vadd.f32 %v1909_v55, %v1085_v58  ;;  %v1088_v63 = vadd.f32 %v1848_v59, %v284_v47 }
 0x126   :  { %v2605_v1 = vadd.f32 %v1912_v61, %v1088_v63  ;;  %v1849_v2 = vpop.f32.mrb[24].mxu0 }
 0x127   :  { %v1913_v5 = vpop.f32.mrb[24].mxu1  ;;  %v1850_v6 = vpop.f32.mrb[25].mxu0 }
 0x128   :  { %v1851_v8 = vadd.f32 %v1850_v6, %v1849_v2  ;;  %v1914_v9 = vpop.f32.mrb[25].mxu1  ;;  %v1852_v10 = vpop.f32.mrb[26].mxu0 }
 0x129   :  { %v1915_v11 = vadd.f32 %v1914_v9, %v1913_v5  ;;  %v1916_v12 = vpop.f32.mrb[26].mxu1  ;;  %v1853_v13 = vpop.f32.mrb[27].mxu0 }
 0x12a   :  { %v1093_v14 = vadd.f32 %v1851_v8, %v289_v0  ;;  %v1854_v15 = vadd.f32 %v1853_v13, %v1852_v10  ;;  %v1917_v16 = vpop.f32.mrb[27].mxu1 }
 0x12b   :  { %v1918_v17 = vadd.f32 %v1917_v16, %v1916_v12 }
 0x12c   :  { %v2607_v18 = vadd.f32 %v1915_v11, %v1093_v14  ;;  %v1096_v19 = vadd.f32 %v1854_v15, %v294_v3 }
 0x12e   :  { %v2609_v21 = vadd.f32 %v1918_v17, %v1096_v19  ;;  %v1855_v23 = vpop.f32.mrb[28].mxu0 }
 0x12f   :  { %v1919_v26 = vpop.f32.mrb[28].mxu1  ;;  %v1856_v27 = vpop.f32.mrb[29].mxu0 }
 0x130   :  { %v1857_v28 = vadd.f32 %v1856_v27, %v1855_v23  ;;  %v1920_v29 = vpop.f32.mrb[29].mxu1  ;;  %v1858_v30 = vpop.f32.mrb[30].mxu0 }
 0x131   :  { %v1921_v31 = vadd.f32 %v1920_v29, %v1919_v26  ;;  %v1922_v32 = vpop.f32.mrb[30].mxu1  ;;  %v1859_v34 = vpop.f32.mrb[31].mxu0 }
 0x132   :  { %v1101_v36 = vadd.f32 %v1857_v28, %v299_v20  ;;  %v1860_v37 = vadd.f32 %v1859_v34, %v1858_v30  ;;  %v1923_v38 = vpop.f32.mrb[31].mxu1 }
 0x133   :  { %v1924_v39 = vadd.f32 %v1923_v38, %v1922_v32 }
 0x134   :  { %v2611_v40 = vadd.f32 %v1921_v31, %v1101_v36  ;;  %v1104_v41 = vadd.f32 %v1860_v37, %v304_v24 }
 0x136   :  { %v2613_v43 = vadd.f32 %v1924_v39, %v1104_v41  ;;  %v1941_v44 = vpop.f32.mrb[32].mxu0 }
 0x137   :  { %v2005_v46 = vpop.f32.mrb[32].mxu1  ;;  %v1942_v47 = vpop.f32.mrb[33].mxu0 }
 0x138   :  { %v1943_v48 = vadd.f32 %v1942_v47, %v1941_v44  ;;  %v2006_v49 = vpop.f32.mrb[33].mxu1  ;;  %v1944_v51 = vpop.f32.mrb[34].mxu0 }
 0x139   :  { %v2007_v52 = vadd.f32 %v2006_v49, %v2005_v46  ;;  %v2008_v54 = vpop.f32.mrb[34].mxu1  ;;  %v1945_v55 = vpop.f32.mrb[35].mxu0 }
 0x13a   :  { %v1239_v56 = vadd.f32 %v1943_v48, %v2583_v33  ;;  %v1946_v57 = vadd.f32 %v1945_v55, %v1944_v51  ;;  %v2009_v58 = vpop.f32.mrb[35].mxu1 }
 0x13b   :  { %v2010_v59 = vadd.f32 %v2009_v58, %v2008_v54 }
 0x13c   :  { %v1336_v60 = vadd.f32 %v2007_v52, %v1239_v56  ;;  %v1242_v61 = vadd.f32 %v1946_v57, %v2585_v35 }
 0x13e   :  { %v1781_v63 = vpack.c.bf16 %v1336_v60, %v1336_v60  ;;  %v1339_v0 = vadd.f32 %v2010_v59, %v1242_v61  ;;  %v1947_v2 = vpop.f32.mrb[36].mxu0  ;;  %v1480_v3 = vsel %vm1479_vm0, %v1336_v60, 0.0  ;;  %v1545_v8 = vmul.f32 %v1336_v60, %v1336_v60 }
 0x13f   :  { %v2011_v5 = vpop.f32.mrb[36].mxu1  ;;  %v1948_v6 = vpop.f32.mrb[37].mxu0  ;;  %1481 = vadd.xlane.f32.xlu0 %v1480_v3 }
 0x140   :  { %1463 = vst.msk [vmem:[%s2858_s3] sm:$0xf] %vm1462_vm1, %v1781_v63  ;;  %v1782_v33 = vpack.c.bf16 %v1339_v0, %v1339_v0  ;;  %v1949_v9 = vadd.f32 %v1948_v6, %v1947_v2  ;;  %v2012_v10 = vpop.f32.mrb[37].mxu1  ;;  %v1950_v11 = vpop.f32.mrb[38].mxu0  ;;  %v1483_v35 = vsel %vm1479_vm0, %v1339_v0, 0.0  ;;  %v1546_v12 = vmul.f32 %v1339_v0, %v1339_v0 }
 0x141   :  { %v2013_v13 = vadd.f32 %v2012_v10, %v2011_v5  ;;  %v2014_v14 = vpop.f32.mrb[38].mxu1  ;;  %v1951_v15 = vpop.f32.mrb[39].mxu0  ;;  %1484 = vadd.xlane.f32.xlu1 %v1483_v35  ;;  %v1561_v27 = vsel %vm1479_vm0, %v1545_v8, 0.0 }
 0x142   :  { %1464 = vst.msk [vmem:[%s2858_s3 + $0x4] sm:$0xf] %vm1462_vm1, %v1782_v33  ;;  %v1247_v16 = vadd.f32 %v1949_v9, %v2587_v50  ;;  %v1952_v17 = vadd.f32 %v1951_v15, %v1950_v11  ;;  %v2015_v19 = vpop.f32.mrb[39].mxu1  ;;  %v1564_v20 = vsel %vm1479_vm0, %v1546_v12, 0.0 }
 0x143   :  { %v2016_v23 = vadd.f32 %v2015_v19, %v2014_v14  ;;  %1565 = vadd.xlane.f32.xlu0 %v1564_v20 }
 0x144   :  { %v1344_v24 = vadd.f32 %v2013_v13, %v1247_v16  ;;  %v1250_v26 = vadd.f32 %v1952_v17, %v2589_v53 }
 0x145   :  { %1562 = vadd.xlane.f32.xlu1 %v1561_v27 }
 0x146   :  { %v1783_v28 = vpack.c.bf16 %v1344_v24, %v1344_v24  ;;  %v1347_v29 = vadd.f32 %v2016_v23, %v1250_v26  ;;  %v1953_v30 = vpop.f32.mrb[40].mxu0  ;;  %v1486_v31 = vsel %vm1479_vm0, %v1344_v24, 0.0  ;;  %v1547_v32 = vmul.f32 %v1344_v24, %v1344_v24 }
 0x147   :  { %v1954_v34 = vpop.f32.mrb[41].mxu0  ;;  %1487 = vadd.xlane.f32.xlu0 %v1486_v31  ;;  %v2017_v50 = vpop.f32.mrb[40].mxu1 }
 0x148   :  { %1465 = vst.msk [vmem:[%s2858_s3 + $0x8] sm:$0xf] %vm1462_vm1, %v1783_v28  ;;  %v1784_v36 = vpack.c.bf16 %v1347_v29, %v1347_v29  ;;  %v1955_v37 = vadd.f32 %v1954_v34, %v1953_v30  ;;  %v1956_v53 = vpop.f32.mrb[42].mxu0  ;;  %v2018_v38 = vpop.f32.mrb[41].mxu1  ;;  %v1567_v39 = vsel %vm1479_vm0, %v1547_v32, 0.0  ;;  %v1548_v47 = vmul.f32 %v1347_v29, %v1347_v29 }
 0x149   :  { %v1957_v41 = vpop.f32.mrb[43].mxu0  ;;  %v2019_v44 = vadd.f32 %v2018_v38, %v2017_v50  ;;  %1568 = vadd.xlane.f32.xlu1 %v1567_v39  ;;  %v2020_v46 = vpop.f32.mrb[42].mxu1  ;;  %v1489_v52 = vsel %vm1479_vm0, %v1347_v29, 0.0 }
 0x14a   :  { %1466 = vst.msk [vmem:[%s2858_s3 + $0xc] sm:$0xf] %vm1462_vm1, %v1784_v36  ;;  %v1255_v48 = vadd.f32 %v1955_v37, %v2591_v4  ;;  %v1958_v49 = vadd.f32 %v1957_v41, %v1956_v53  ;;  %v2021_v51 = vpop.f32.mrb[43].mxu1  ;;  %v1570_v57 = vsel %vm1479_vm0, %v1548_v47, 0.0 }
 0x14b   :  { %v2022_v54 = vadd.f32 %v2021_v51, %v2020_v46  ;;  %1490 = vadd.xlane.f32.xlu0 %v1489_v52 }
 0x14c   :  { %v1258_v55 = vadd.f32 %v1958_v49, %v2593_v7  ;;  %v1352_v56 = vadd.f32 %v2019_v44, %v1255_v48 }
 0x14e   :  { %v1785_v58 = vpack.c.bf16 %v1352_v56, %v1352_v56  ;;  %v1355_v59 = vadd.f32 %v2022_v54, %v1258_v55  ;;  %v1959_v60 = vpop.f32.mrb[44].mxu0  ;;  %v1492_v61 = vsel %vm1479_vm0, %v1352_v56, 0.0  ;;  %v1549_v63 = vmul.f32 %v1352_v56, %v1352_v56 }
 0x14f   :  { %v1960_v0 = vpop.f32.mrb[45].mxu0  ;;  %1493 = vadd.xlane.f32.xlu1 %v1492_v61  ;;  %1571 = vadd.xlane.f32.xlu0 %v1570_v57  ;;  %v2023_v4 = vpop.f32.mrb[44].mxu1 }
 0x150   :  { %1467 = vst.msk [vmem:[%s2858_s3 + $0x10] sm:$0xf] %vm1462_vm1, %v1785_v58  ;;  %v1786_v2 = vpack.c.bf16 %v1355_v59, %v1355_v59  ;;  %v1961_v7 = vadd.f32 %v1960_v0, %v1959_v60  ;;  %v1962_v3 = vpop.f32.mrb[46].mxu0  ;;  %v2024_v5 = vpop.f32.mrb[45].mxu1  ;;  %v1550_v9 = vmul.f32 %v1355_v59, %v1355_v59  ;;  %v1573_v12 = vsel %vm1479_vm0, %v1549_v63, 0.0 }
 0x151   :  { %v1963_v6 = vpop.f32.mrb[47].mxu0  ;;  %v2025_v8 = vadd.f32 %v2024_v5, %v2023_v4  ;;  %v2026_v33 = vpop.f32.mrb[46].mxu1  ;;  %v1495_v13 = vsel %vm1479_vm0, %v1355_v59, 0.0 }
 0x152   :  { %1468 = vst.msk [vmem:[%s2858_s3 + $0x14] sm:$0xf] %vm1462_vm1, %v1786_v2  ;;  %v1263_v10 = vadd.f32 %v1961_v7, %v2595_v22  ;;  %v1964_v11 = vadd.f32 %v1963_v6, %v1962_v3  ;;  %v2027_v35 = vpop.f32.mrb[47].mxu1  ;;  %v1576_v17 = vsel %vm1479_vm0, %v1550_v9, 0.0 }
 0x153   :  { %v2028_v14 = vadd.f32 %v2027_v35, %v2026_v33  ;;  %1574 = vadd.xlane.f32.xlu1 %v1573_v12  ;;  %1496 = vadd.xlane.f32.xlu0 %v1495_v13 }
 0x154   :  { %v1266_v15 = vadd.f32 %v1964_v11, %v2597_v25  ;;  %v1360_v16 = vadd.f32 %v2025_v8, %v1263_v10 }
 0x156   :  { %v1787_v19 = vpack.c.bf16 %v1360_v16, %v1360_v16  ;;  %v1363_v20 = vadd.f32 %v2028_v14, %v1266_v15  ;;  %v1965_v23 = vpop.f32.mrb[48].mxu0  ;;  %v1498_v24 = vsel %vm1479_vm0, %v1360_v16, 0.0  ;;  %v1551_v22 = vmul.f32 %v1360_v16, %v1360_v16 }
 0x157   :  { %v1966_v26 = vpop.f32.mrb[49].mxu0  ;;  %1499 = vadd.xlane.f32.xlu1 %v1498_v24  ;;  %1577 = vadd.xlane.f32.xlu0 %v1576_v17  ;;  %v2029_v27 = vpop.f32.mrb[48].mxu1 }
 0x158   :  { %1469 = vst.msk [vmem:[%s2858_s3 + $0x18] sm:$0xf] %vm1462_vm1, %v1787_v19  ;;  %v1788_v28 = vpack.c.bf16 %v1363_v20, %v1363_v20  ;;  %v1967_v25 = vadd.f32 %v1966_v26, %v1965_v23  ;;  %v1968_v29 = vpop.f32.mrb[50].mxu0  ;;  %v2030_v30 = vpop.f32.mrb[49].mxu1  ;;  %v1552_v50 = vmul.f32 %v1363_v20, %v1363_v20  ;;  %v1579_v38 = vsel %vm1479_vm0, %v1551_v22, 0.0 }
 0x159   :  { %v1969_v31 = vpop.f32.mrb[51].mxu0  ;;  %v2031_v32 = vadd.f32 %v2030_v30, %v2029_v27  ;;  %v2032_v34 = vpop.f32.mrb[50].mxu1  ;;  %v1501_v39 = vsel %vm1479_vm0, %v1363_v20, 0.0 }
 0x15a   :  { %1470 = vst.msk [vmem:[%s2858_s3 + $0x1c] sm:$0xf] %vm1462_vm1, %v1788_v28  ;;  %v1271_v36 = vadd.f32 %v1967_v25, %v2599_v42  ;;  %v1970_v37 = vadd.f32 %v1969_v31, %v1968_v29  ;;  %v2033_v53 = vpop.f32.mrb[51].mxu1  ;;  %v1582_v47 = vsel %vm1479_vm0, %v1552_v50, 0.0 }
 0x15b   :  { %v2034_v41 = vadd.f32 %v2033_v53, %v2032_v34  ;;  %1580 = vadd.xlane.f32.xlu1 %v1579_v38  ;;  %1502 = vadd.xlane.f32.xlu0 %v1501_v39 }
 0x15c   :  { %v1274_v44 = vadd.f32 %v1970_v37, %v2601_v45  ;;  %v1368_v46 = vadd.f32 %v2031_v32, %v1271_v36 }
 0x15e   :  { %v1789_v48 = vpack.c.bf16 %v1368_v46, %v1368_v46  ;;  %v1371_v49 = vadd.f32 %v2034_v41, %v1274_v44  ;;  %v1971_v51 = vpop.f32.mrb[52].mxu0  ;;  %v1504_v52 = vsel %vm1479_vm0, %v1368_v46, 0.0  ;;  %v1553_v42 = vmul.f32 %v1368_v46, %v1368_v46 }
 0x15f   :  { %v1972_v54 = vpop.f32.mrb[53].mxu0  ;;  %1505 = vadd.xlane.f32.xlu1 %v1504_v52  ;;  %1583 = vadd.xlane.f32.xlu0 %v1582_v47  ;;  %v2035_v55 = vpop.f32.mrb[52].mxu1 }
 0x160   :  { %1471 = vst.msk [vmem:[%s2858_s3 + $0x20] sm:$0xf] %vm1462_vm1, %v1789_v48  ;;  %v1790_v56 = vpack.c.bf16 %v1371_v49, %v1371_v49  ;;  %v1973_v45 = vadd.f32 %v1972_v54, %v1971_v51  ;;  %v1974_v57 = vpop.f32.mrb[54].mxu0  ;;  %v2036_v58 = vpop.f32.mrb[53].mxu1  ;;  %v1554_v63 = vmul.f32 %v1371_v49, %v1371_v49  ;;  %v1585_v7 = vsel %vm1479_vm0, %v1553_v42, 0.0 }
 0x161   :  { %v1975_v59 = vpop.f32.mrb[55].mxu0  ;;  %v2037_v60 = vadd.f32 %v2036_v58, %v2035_v55  ;;  %v2038_v61 = vpop.f32.mrb[54].mxu1  ;;  %v1507_v3 = vsel %vm1479_vm0, %v1371_v49, 0.0 }
 0x162   :  { %1472 = vst.msk [vmem:[%s2858_s3 + $0x24] sm:$0xf] %vm1462_vm1, %v1790_v56  ;;  %v1279_v0 = vadd.f32 %v1973_v45, %v2603_v62  ;;  %v1976_v4 = vadd.f32 %v1975_v59, %v1974_v57  ;;  %v2039_v2 = vpop.f32.mrb[55].mxu1  ;;  %v1588_v33 = vsel %vm1479_vm0, %v1554_v63, 0.0 }
 0x163   :  { %v2040_v5 = vadd.f32 %v2039_v2, %v2038_v61  ;;  %1586 = vadd.xlane.f32.xlu1 %v1585_v7  ;;  %1508 = vadd.xlane.f32.xlu0 %v1507_v3 }
 0x164   :  { %v1282_v6 = vadd.f32 %v1976_v4, %v2605_v1  ;;  %v1376_v8 = vadd.f32 %v2037_v60, %v1279_v0 }
 0x166   :  { %v1791_v9 = vpack.c.bf16 %v1376_v8, %v1376_v8  ;;  %v1379_v10 = vadd.f32 %v2040_v5, %v1282_v6  ;;  %v1977_v11 = vpop.f32.mrb[56].mxu0  ;;  %v1510_v35 = vsel %vm1479_vm0, %v1376_v8, 0.0  ;;  %v1555_v62 = vmul.f32 %v1376_v8, %v1376_v8 }
 0x167   :  { %v1978_v12 = vpop.f32.mrb[57].mxu0  ;;  %1511 = vadd.xlane.f32.xlu1 %v1510_v35  ;;  %1589 = vadd.xlane.f32.xlu0 %v1588_v33  ;;  %v2041_v13 = vpop.f32.mrb[56].mxu1 }
 0x168   :  { %1473 = vst.msk [vmem:[%s2858_s3 + $0x28] sm:$0xf] %vm1462_vm1, %v1791_v9  ;;  %v1792_v14 = vpack.c.bf16 %v1379_v10, %v1379_v10  ;;  %v1979_v1 = vadd.f32 %v1978_v12, %v1977_v11  ;;  %v1980_v15 = vpop.f32.mrb[58].mxu0  ;;  %v2042_v16 = vpop.f32.mrb[57].mxu1  ;;  %v1556_v23 = vmul.f32 %v1379_v10, %v1379_v10  ;;  %v1591_v27 = vsel %vm1479_vm0, %v1555_v62, 0.0 }
 0x169   :  { %v1981_v17 = vpop.f32.mrb[59].mxu0  ;;  %v2043_v19 = vadd.f32 %v2042_v16, %v2041_v13  ;;  %v2044_v20 = vpop.f32.mrb[58].mxu1  ;;  %v1513_v28 = vsel %vm1479_vm0, %v1379_v10, 0.0 }
 0x16a   :  { %1474 = vst.msk [vmem:[%s2858_s3 + $0x2c] sm:$0xf] %vm1462_vm1, %v1792_v14  ;;  %v1287_v24 = vadd.f32 %v1979_v1, %v2607_v18  ;;  %v1982_v22 = vadd.f32 %v1981_v17, %v1980_v15  ;;  %v2045_v26 = vpop.f32.mrb[59].mxu1  ;;  %v1594_v31 = vsel %vm1479_vm0, %v1556_v23, 0.0 }
 0x16b   :  { %v2046_v25 = vadd.f32 %v2045_v26, %v2044_v20  ;;  %1592 = vadd.xlane.f32.xlu1 %v1591_v27  ;;  %1514 = vadd.xlane.f32.xlu0 %v1513_v28 }
 0x16c   :  { %v1290_v29 = vadd.f32 %v1982_v22, %v2609_v21  ;;  %v1384_v30 = vadd.f32 %v2043_v19, %v1287_v24 }
 0x16e   :  { %v1793_v32 = vpack.c.bf16 %v1384_v30, %v1384_v30  ;;  %v1387_v34 = vadd.f32 %v2046_v25, %v1290_v29  ;;  %v1983_v50 = vpop.f32.mrb[60].mxu0  ;;  %v1516_v36 = vsel %vm1479_vm0, %v1384_v30, 0.0  ;;  %v1557_v18 = vmul.f32 %v1384_v30, %v1384_v30 }
 0x16f   :  { %v1984_v37 = vpop.f32.mrb[61].mxu0  ;;  %1517 = vadd.xlane.f32.xlu1 %v1516_v36  ;;  %1595 = vadd.xlane.f32.xlu0 %v1594_v31  ;;  %v2047_v53 = vpop.f32.mrb[60].mxu1 }
 0x170   :  { %1475 = vst.msk [vmem:[%s2858_s3 + $0x30] sm:$0xf] %vm1462_vm1, %v1793_v32  ;;  %v1794_v38 = vpack.c.bf16 %v1387_v34, %v1387_v34  ;;  %v1985_v21 = vadd.f32 %v1984_v37, %v1983_v50  ;;  %v1986_v39 = vpop.f32.mrb[62].mxu0  ;;  %v2048_v41 = vpop.f32.mrb[61].mxu1  ;;  %v1558_v48 = vmul.f32 %v1387_v34, %v1387_v34  ;;  %v1597_v42 = vsel %vm1479_vm0, %v1557_v18, 0.0 }
 0x171   :  { %v1987_v44 = vpop.f32.mrb[63].mxu0  ;;  %v2049_v46 = vadd.f32 %v2048_v41, %v2047_v53  ;;  %v2050_v47 = vpop.f32.mrb[62].mxu1  ;;  %v1519_v54 = vsel %vm1479_vm0, %v1387_v34, 0.0 }
 0x172   :  { %1476 = vst.msk [vmem:[%s2858_s3 + $0x34] sm:$0xf] %vm1462_vm1, %v1794_v38  ;;  %v1295_v49 = vadd.f32 %v1985_v21, %v2611_v40  ;;  %v1988_v51 = vadd.f32 %v1987_v44, %v1986_v39  ;;  %v2051_v52 = vpop.f32.mrb[63].mxu1  ;;  %v1600_v57 = vsel %vm1479_vm0, %v1558_v48, 0.0 }
 0x173   :  { %v2052_v55 = vadd.f32 %v2051_v52, %v2050_v47  ;;  %1598 = vadd.xlane.f32.xlu1 %v1597_v42  ;;  %1520 = vadd.xlane.f32.xlu0 %v1519_v54 }
 0x174   :  { %v1298_v56 = vadd.f32 %v1988_v51, %v2613_v43  ;;  %v1392_v45 = vadd.f32 %v2049_v46, %v1295_v49 }
 0x176   :  { %v1795_v58 = vpack.c.bf16 %v1392_v45, %v1392_v45  ;;  %v1395_v59 = vadd.f32 %v2052_v55, %v1298_v56  ;;  %v1522_v60 = vsel %vm1479_vm0, %v1392_v45, 0.0  ;;  %v1559_v61 = vmul.f32 %v1392_v45, %v1392_v45 }
 0x177   :  { %1523 = vadd.xlane.f32.xlu1 %v1522_v60  ;;  %1601 = vadd.xlane.f32.xlu0 %v1600_v57 }
 0x178   :  { %1477 = vst.msk [vmem:[%s2858_s3 + $0x38] sm:$0xf] %vm1462_vm1, %v1795_v58  ;;  %v1796_v40 = vpack.c.bf16 %v1395_v59, %v1395_v59  ;;  %v1560_v63 = vmul.f32 %v1395_v59, %v1395_v59  ;;  %v1603_v43 = vsel %vm1479_vm0, %v1559_v61, 0.0  ;;  %v1525_v0 = vsel %vm1479_vm0, %v1395_v59, 0.0 }
 0x17a   :  { %1478 = vst.msk [vmem:[%s2858_s3 + $0x3c] sm:$0xf] %vm1462_vm1, %v1796_v40  ;;  %v1606_v4 = vsel %vm1479_vm0, %v1560_v63, 0.0 }
 0x17b   :  { %1604 = vadd.xlane.f32.xlu1 %v1603_v43  ;;  %1526 = vadd.xlane.f32.xlu0 %v1525_v0 }
 0x17f   :  { %1607 = vadd.xlane.f32.xlu0 %v1606_v4 }
 0x1cc   :  { %v1482_v2 = vpop.xlane.xlu0 %1481 }
 0x1cd   :  { %1529 = vst.msk [vmem:[%s2859_s4] sm:$0xff] %vm1528_vm2, %v1482_v2 }
 0x1ce   :  { %v1485_v7 = vpop.xlane.xlu1 %1484 }
 0x1cf   :  { %1530 = vst.msk [vmem:[%s2859_s4 + $0x8] sm:$0xff] %vm1528_vm2, %v1485_v7 }
 0x1d0   :  { %v1566_v3 = vpop.xlane.xlu0 %1565 }
 0x1d1   :  { %1610 = vst.msk [vmem:[%s2860_s5 + $0x8] sm:$0xff] %vm1528_vm2, %v1566_v3 }
 0x1d2   :  { %v1563_v5 = vpop.xlane.xlu1 %1562 }
 0x1d3   :  { %1609 = vst.msk [vmem:[%s2860_s5] sm:$0xff] %vm1528_vm2, %v1563_v5 }
 0x1d4   :  { %v1488_v6 = vpop.xlane.xlu0 %1487 }
 0x1d5   :  { %1531 = vst.msk [vmem:[%s2859_s4 + $0x10] sm:$0xff] %vm1528_vm2, %v1488_v6 }
 0x1d6   :  { %v1569_v8 = vpop.xlane.xlu1 %1568 }
 0x1d7   :  { %1611 = vst.msk [vmem:[%s2860_s5 + $0x10] sm:$0xff] %vm1528_vm2, %v1569_v8 }
 0x1d8   :  { %v1491_v33 = vpop.xlane.xlu0 %1490 }
 0x1d9   :  { %1532 = vst.msk [vmem:[%s2859_s4 + $0x18] sm:$0xff] %vm1528_vm2, %v1491_v33 }
 0x1dc   :  { %v1494_v9 = vpop.xlane.xlu1 %1493  ;;  %v1572_v10 = vpop.xlane.xlu0 %1571 }
 0x1dd   :  { %1533 = vst.msk [vmem:[%s2859_s4 + $0x20] sm:$0xff] %vm1528_vm2, %v1494_v9  ;;  %1612 = vst.msk [vmem:[%s2860_s5 + $0x18] sm:$0xff] %vm1528_vm2, %v1572_v10 }
 0x1e0   :  { %v1575_v11 = vpop.xlane.xlu1 %1574  ;;  %v1497_v35 = vpop.xlane.xlu0 %1496 }
 0x1e1   :  { %1613 = vst.msk [vmem:[%s2860_s5 + $0x20] sm:$0xff] %vm1528_vm2, %v1575_v11  ;;  %1534 = vst.msk [vmem:[%s2859_s4 + $0x28] sm:$0xff] %vm1528_vm2, %v1497_v35 }
 0x1e4   :  { %v1500_v62 = vpop.xlane.xlu1 %1499  ;;  %v1578_v12 = vpop.xlane.xlu0 %1577 }
 0x1e5   :  { %1535 = vst.msk [vmem:[%s2859_s4 + $0x30] sm:$0xff] %vm1528_vm2, %v1500_v62  ;;  %1614 = vst.msk [vmem:[%s2860_s5 + $0x28] sm:$0xff] %vm1528_vm2, %v1578_v12 }
 0x1e8   :  { %v1581_v13 = vpop.xlane.xlu1 %1580  ;;  %v1503_v14 = vpop.xlane.xlu0 %1502 }
 0x1e9   :  { %1615 = vst.msk [vmem:[%s2860_s5 + $0x30] sm:$0xff] %vm1528_vm2, %v1581_v13  ;;  %1536 = vst.msk [vmem:[%s2859_s4 + $0x38] sm:$0xff] %vm1528_vm2, %v1503_v14 }
 0x1ec   :  { %v1506_v1 = vpop.xlane.xlu1 %1505  ;;  %v1584_v15 = vpop.xlane.xlu0 %1583 }
 0x1ed   :  { %1537 = vst.msk [vmem:[%s2859_s4 + $0x40] sm:$0xff] %vm1528_vm2, %v1506_v1  ;;  %1616 = vst.msk [vmem:[%s2860_s5 + $0x38] sm:$0xff] %vm1528_vm2, %v1584_v15 }
 0x1f0   :  { %v1587_v16 = vpop.xlane.xlu1 %1586  ;;  %v1509_v17 = vpop.xlane.xlu0 %1508 }
 0x1f1   :  { %1617 = vst.msk [vmem:[%s2860_s5 + $0x40] sm:$0xff] %vm1528_vm2, %v1587_v16  ;;  %1538 = vst.msk [vmem:[%s2859_s4 + $0x48] sm:$0xff] %vm1528_vm2, %v1509_v17 }
 0x1f4   :  { %v1512_v19 = vpop.xlane.xlu1 %1511  ;;  %v1590_v20 = vpop.xlane.xlu0 %1589 }
 0x1f5   :  { %1539 = vst.msk [vmem:[%s2859_s4 + $0x50] sm:$0xff] %vm1528_vm2, %v1512_v19  ;;  %1618 = vst.msk [vmem:[%s2860_s5 + $0x48] sm:$0xff] %vm1528_vm2, %v1590_v20 }
 0x1f8   :  { %v1593_v23 = vpop.xlane.xlu1 %1592  ;;  %v1515_v24 = vpop.xlane.xlu0 %1514 }
 0x1f9   :  { %1619 = vst.msk [vmem:[%s2860_s5 + $0x50] sm:$0xff] %vm1528_vm2, %v1593_v23  ;;  %1540 = vst.msk [vmem:[%s2859_s4 + $0x58] sm:$0xff] %vm1528_vm2, %v1515_v24 }
 0x1fc   :  { %v1518_v22 = vpop.xlane.xlu1 %1517  ;;  %v1596_v26 = vpop.xlane.xlu0 %1595 }
 0x1fd   :  { %1541 = vst.msk [vmem:[%s2859_s4 + $0x60] sm:$0xff] %vm1528_vm2, %v1518_v22  ;;  %1620 = vst.msk [vmem:[%s2860_s5 + $0x58] sm:$0xff] %vm1528_vm2, %v1596_v26 }
 0x200   :  { %v1599_v27 = vpop.xlane.xlu1 %1598  ;;  %v1521_v28 = vpop.xlane.xlu0 %1520 }
 0x201   :  { %1621 = vst.msk [vmem:[%s2860_s5 + $0x60] sm:$0xff] %vm1528_vm2, %v1599_v27  ;;  %1542 = vst.msk [vmem:[%s2859_s4 + $0x68] sm:$0xff] %vm1528_vm2, %v1521_v28 }
 0x204   :  { %v1524_v25 = vpop.xlane.xlu1 %1523  ;;  %v1602_v29 = vpop.xlane.xlu0 %1601 }
 0x205   :  { %1543 = vst.msk [vmem:[%s2859_s4 + $0x70] sm:$0xff] %vm1528_vm2, %v1524_v25  ;;  %1622 = vst.msk [vmem:[%s2860_s5 + $0x68] sm:$0xff] %vm1528_vm2, %v1602_v29 }
 0x208   :  { %v1605_v30 = vpop.xlane.xlu1 %1604  ;;  %v1527_v31 = vpop.xlane.xlu0 %1526 }
 0x209   :  { %1623 = vst.msk [vmem:[%s2860_s5 + $0x70] sm:$0xff] %vm1528_vm2, %v1605_v30  ;;  %1544 = vst.msk [vmem:[%s2859_s4 + $0x78] sm:$0xff] %vm1528_vm2, %v1527_v31 }
 0x20c   :  { %v1608_v32 = vpop.xlane.xlu0 %1607 }
 0x20d   :  { %1624 = vst.msk [vmem:[%s2860_s5 + $0x78] sm:$0xff] %vm1528_vm2, %v1608_v32 }

</bundles_post_ra>
